<compile_context>
chip_gen: v7x
topology: tpu7x:2x2x1
jax: 0.10.0
libtpu: 0.0.40
codegen_flags: <defaults>
</compile_context>

<pallas_src>
import math

import jax
import jax.numpy as jnp
from jax.experimental import pallas as pl
from jax.experimental.pallas import tpu as pltpu

LANES = 128                 # every output-feature dim padded to this (lane-dense)
CONV1_K_PAD = 128           # im2col K: 25  -> 128
CONV2_K_PAD = 256           # im2col K: 150 -> 256
MATMUL_DTYPE = jnp.bfloat16  # MXU operand dtype; jnp.float32 for strict parity


# ---------------------------------------------------------------------------
# Kernel 1: conv1-as-GEMM (4 stacked pool corners) + corner max + bias + ReLU
# ---------------------------------------------------------------------------
def _conv_pool_kernel(p_ref, w_ref, b_ref, o_ref):
    """p_ref: (4, BM, K) stacked 2x2-pool-corner im2col patches.

    maxpool(relu(conv+b)) == relu(max_corners(patch @ W) + b) because the bias
    is shared per channel and ReLU is monotone.  One contiguous MXU GEMM over
    all four corners, then a VPU max-reduce; bias/ReLU in f32.
    """
    c, bm, k = p_ref.shape
    p = p_ref[...].reshape(c * bm, k)                       # leading-dim merge
    s = jnp.dot(p, w_ref[...], preferred_element_type=jnp.float32)
    s = s.reshape(c, bm, s.shape[-1]).max(axis=0)           # corner max (VPU)
    o_ref[...] = jnp.maximum(s + b_ref[...], 0.0).astype(o_ref.dtype)


def conv_pool(patches, w, b, rows_per_block, out_dtype):
    """(4, M, K) stacked corner patches -> (M, 128) pooled activations."""
    _, M, K = patches.shape
    N = w.shape[1]
    flops = 2 * 4 * M * K * N
    bytes_accessed = int(patches.size) * patches.dtype.itemsize \
        + int(w.size) * w.dtype.itemsize + int(b.size) * b.dtype.itemsize \
        + M * N * jnp.dtype(out_dtype).itemsize
    return pl.pallas_call(
        _conv_pool_kernel,
        out_shape=jax.ShapeDtypeStruct((M, N), out_dtype),
        grid=(M // rows_per_block,),
        in_specs=[
            pl.BlockSpec((4, rows_per_block, K), lambda i: (0, i, 0)),
            pl.BlockSpec((K, N), lambda i: (0, 0)),
            pl.BlockSpec((1, N), lambda i: (0, 0)),
        ],
        out_specs=pl.BlockSpec((rows_per_block, N), lambda i: (i, 0)),
        compiler_params=pltpu.CompilerParams(
            dimension_semantics=("parallel",)),
        cost_estimate=pl.CostEstimate(flops=flops, transcendentals=0,
                                      bytes_accessed=bytes_accessed),
    )(patches, w, b)


# ---------------------------------------------------------------------------
# Kernel 2: conv2 + pool + flatten + fc1 + fc2 + head layer1/2/3 (one kernel)
# ---------------------------------------------------------------------------
def _conv2_fc_head_kernel(p_ref, w2_ref, b2_ref, wf1_ref, bf1_ref,
                          wf2_ref, bf2_ref, wl1_ref, bl1_ref,
                          wl2_ref, bl2_ref, wl3_ref, bl3_ref, o_ref):
    c, rows, k = p_ref.shape                 # rows = bs * 16 pooled pixels
    bs = rows // 16
    n_lanes = o_ref.shape[-1]

    # conv2: one stacked-corner GEMM, corner max, bias + ReLU (f32 math).
    p = p_ref[...].reshape(c * rows, k)
    s = jnp.dot(p, w2_ref[...], preferred_element_type=jnp.float32)
    s = s.reshape(c, rows, n_lanes).max(axis=0)
    h2 = jnp.maximum(s + b2_ref[...], 0.0)                  # (bs*16, 128)

    # flatten + fc1: PyTorch's (cin,h,w) flatten is folded into the fc1 weight
    # layout (pre-arranged outside as (16 positions, 128 cin, 128 out)), so
    # the "flatten" is just a sum of 16 per-position GEMMs — no sublane->lane
    # relayout inside the kernel.
    h2_mm = h2.astype(wf1_ref.dtype).reshape(bs, 16, n_lanes)
    acc = jnp.zeros((bs, n_lanes), jnp.float32)
    for pos in range(16):
        acc = acc + jnp.dot(h2_mm[:, pos, :], wf1_ref[pos],
                            preferred_element_type=jnp.float32)
    h = jnp.maximum(acc + bf1_ref[...], 0.0)                 # fc1 + ReLU

    def lin(h_in, w_ref, b_ref, relu):
        y = jnp.dot(h_in.astype(w_ref.dtype), w_ref[...],
                    preferred_element_type=jnp.float32) + b_ref[...]
        return jnp.maximum(y, 0.0) if relu else y

    h = lin(h, wf2_ref, bf2_ref, True)        # LeNet fc2 (120 -> 84) = feats
    h = lin(h, wl1_ref, bl1_ref, True)        # head layer1 (84 -> 5) + ReLU
    h = lin(h, wl2_ref, bl2_ref, True)        # head layer2 (5 -> 10) + ReLU
    o_ref[...] = lin(h, wl3_ref, bl3_ref, False).astype(o_ref.dtype)


def conv2_fc_head(patches, q, n, bs):
    """(4, n*16, K2) conv2 corner patches + all FC/head weights -> (n, 128)."""
    _, M, K = patches.shape
    N = LANES
    names = ("conv2", "fc1", "fc2", "layer1", "layer2", "layer3")
    flops = 2 * 4 * M * K * N + n * (2 * 16 * N * N) + n * (4 * 2 * N * N)
    bytes_accessed = int(patches.size) * patches.dtype.itemsize + n * N * 4
    for name in names:
        for suf in ("_w", "_b"):
            a = q[name + suf]
            bytes_accessed += int(a.size) * a.dtype.itemsize

    const2 = lambda i: (0, 0)
    const3 = lambda i: (0, 0, 0)
    in_specs = [pl.BlockSpec((4, bs * 16, K), lambda i: (0, i, 0))]
    operands = [patches]
    for name in names:
        w, b = q[name + "_w"], q[name + "_b"]
        in_specs.append(pl.BlockSpec(w.shape, const3 if w.ndim == 3 else const2))
        in_specs.append(pl.BlockSpec(b.shape, const2))
        operands += [w, b]

    return pl.pallas_call(
        _conv2_fc_head_kernel,
        out_shape=jax.ShapeDtypeStruct((n, N), jnp.float32),
        grid=(n // bs,),
        in_specs=in_specs,
        out_specs=pl.BlockSpec((bs, N), lambda i: (i, 0)),
        compiler_params=pltpu.CompilerParams(
            dimension_semantics=("parallel",)),
        cost_estimate=pl.CostEstimate(flops=flops, transcendentals=0,
                                      bytes_accessed=bytes_accessed),
    )(*operands)


# ---------------------------------------------------------------------------
# Glue (pure data movement, fused by XLA under jit)
# ---------------------------------------------------------------------------
def corner_patches(x_nhwc, kh, kw):
    """Stacked im2col matrices for the four 2x2-pool corners of each pooled
    output pixel.  Row order = (n, pooled_h, pooled_w); col order =
    (kh, kw, cin) — matches the conv weight row layout.
    Returns ((4, n*hp*wp, kh*kw*c), (hp, wp))."""
    n, h, w, c = x_nhwc.shape
    ho, wo = h - kh + 1, w - kw + 1
    assert ho % 2 == 0 and wo % 2 == 0, "2x2 pool must exactly tile conv output"
    hp, wp = ho // 2, wo // 2
    corners = []
    for dy in range(2):
        for dx in range(2):
            cols = []
            for i in range(kh):
                for j in range(kw):
                    sl = x_nhwc[:, dy + i: dy + i + 2 * hp: 2,
                                dx + j: dx + j + 2 * wp: 2, :]
                    cols.append(sl)                       # (n, hp, wp, c)
            patches = jnp.concatenate(cols, axis=-1)      # (n, hp, wp, kh*kw*c)
            corners.append(patches.reshape(n * hp * wp, kh * kw * c))
    return jnp.stack(corners, axis=0), (hp, wp)


def _pad_last(a, k):
    return jnp.pad(a, [(0, 0)] * (a.ndim - 1) + [(0, k - a.shape[-1])])


def _pick_block_samples(n):
    """Samples per grid block: whole batch if small, else a divisor >= 8."""
    if n % 8 != 0:
        return n
    bs = 8
    while bs * 2 <= min(n, 128) and n % (bs * 2) == 0:
        bs *= 2
    return bs


# ---------------------------------------------------------------------------
# Parameters (deterministic, PyTorch-style uniform(-1/sqrt(fan_in), ...))
# ---------------------------------------------------------------------------
def init_linear(key, fan_in, fan_out):
    kw_, kb_ = jax.random.split(key)
    bound = 1.0 / math.sqrt(fan_in)
    w = jax.random.uniform(kw_, (fan_in, fan_out), jnp.float32, -bound, bound)
    b = jax.random.uniform(kb_, (1, fan_out), jnp.float32, -bound, bound)
    return w, b


def init_params(seed=0):
    keys = jax.random.split(jax.random.PRNGKey(seed), 7)
    p = {}
    # Conv weights stored as (kh*kw*cin, cout).  For a real PyTorch state_dict
    # use w.permute(2, 3, 1, 0).reshape(kh*kw*cin, cout) before prepare_params.
    p["conv1_w"], p["conv1_b"] = init_linear(keys[0], 5 * 5 * 1, 6)
    p["conv2_w"], p["conv2_b"] = init_linear(keys[1], 5 * 5 * 6, 16)
    p["fc1_w"], p["fc1_b"] = init_linear(keys[2], 16 * 4 * 4, 120)
    p["fc2_w"], p["fc2_b"] = init_linear(keys[3], 120, 84)
    # LeNet fc3 (84->10 logits) is unused by DAMDebug -> never created.
    p["layer1_w"], p["layer1_b"] = init_linear(keys[4], 84, 5)
    p["layer2_w"], p["layer2_b"] = init_linear(keys[5], 5, 10)
    p["layer3_w"], p["layer3_b"] = init_linear(keys[6], 10, 10)
    return p


def _pad2d(a, rows, cols):
    r, c = a.shape
    return jnp.pad(a, ((0, rows - r), (0, cols - c)))


def prepare_params(p):
    """Zero-pad / re-arrange all weights ONCE outside jit.

    Padded weight rows/cols and bias entries are zero, so padded activation
    lanes stay exactly zero through the chain and real outputs are unchanged.
    Matmul operands are stored in MATMUL_DTYPE; biases stay f32.
    """
    q = {}
    q["conv1_w"] = _pad2d(p["conv1_w"], CONV1_K_PAD, LANES).astype(MATMUL_DTYPE)
    q["conv1_b"] = _pad2d(p["conv1_b"], 1, LANES)
    q["conv2_w"] = _pad2d(p["conv2_w"], CONV2_K_PAD, LANES).astype(MATMUL_DTYPE)
    q["conv2_b"] = _pad2d(p["conv2_b"], 1, LANES)
    # fc1: PyTorch flatten order is (cin, h, w); in-kernel conv2 output keeps
    # spatial positions in rows and cin in lanes, so permute fc1 weight rows to
    # (h, w, cin) and split per spatial position: (16, 128, 128).
    w = p["fc1_w"].reshape(16, 4, 4, 120)                    # (cin, h, w, out)
    w = jnp.transpose(w, (1, 2, 0, 3)).reshape(16, 16, 120)  # (pos, cin, out)
    w = jnp.pad(w, ((0, 0), (0, LANES - 16), (0, LANES - 120)))
    q["fc1_w"] = w.astype(MATMUL_DTYPE)
    q["fc1_b"] = _pad2d(p["fc1_b"], 1, LANES)
    q["fc2_w"] = _pad2d(p["fc2_w"], LANES, LANES).astype(MATMUL_DTYPE)
    q["fc2_b"] = _pad2d(p["fc2_b"], 1, LANES)
    for name in ("layer1", "layer2", "layer3"):
        q[name + "_w"] = _pad2d(p[name + "_w"], LANES, LANES).astype(MATMUL_DTYPE)
        q[name + "_b"] = _pad2d(p[name + "_b"], 1, LANES)
    return q


# ---------------------------------------------------------------------------
# Forward pass (jit-compiled): exactly 2 pallas_calls
# ---------------------------------------------------------------------------
def dam_debug_forward(x_nchw, q):
    n = x_nchw.shape[0]
    bs = _pick_block_samples(n)
    x = jnp.transpose(x_nchw, (0, 2, 3, 1))                    # NCHW -> NHWC

    # conv1 + ReLU + 2x2 pool   (pallas_call #1)  (n,28,28,1) -> (n*144, 128)
    p1, (hp, wp) = corner_patches(x, 5, 5)                     # (4, n*144, 25)
    p1 = _pad_last(p1, CONV1_K_PAD).astype(MATMUL_DTYPE)       # lane-dense K
    y1 = conv_pool(p1, q["conv1_w"], q["conv1_b"], bs * hp * wp, MATMUL_DTYPE)
    y1 = y1.reshape(n, hp, wp, LANES)[..., :6]                 # real channels

    # conv2 + pool + flatten + fc1 + fc2 + head   (pallas_call #2)
    p2, (hp2, wp2) = corner_patches(y1, 5, 5)                  # (4, n*16, 150)
    assert hp2 * wp2 == q["fc1_w"].shape[0]
    p2 = _pad_last(p2, CONV2_K_PAD).astype(MATMUL_DTYPE)
    out = conv2_fc_head(p2, q, n, bs)                          # (n, 128)
    return out[:, :10]                                         # true width


if __name__ == "__main__":
    params = init_params(seed=0)
    padded = prepare_params(params)
    x = jax.random.normal(jax.random.PRNGKey(0), (2, 1, 28, 28), jnp.float32)

    fwd = jax.jit(dam_debug_forward)
    out = jax.block_until_ready(fwd(x, padded))

    assert out.shape == (2, 10), out.shape
    assert bool(jnp.all(jnp.isfinite(out)))
    print("KERNEL_OK")
</pallas_src>

<mosaic_0001>
module attributes {stable_mosaic.version = 11 : i64} {
  func.func @_conv_pool_kernel(%arg0: i32, %arg1: memref<4x288x128xbf16, #tpu.memory_space<vmem>>, %arg2: memref<128x128xbf16, #tpu.memory_space<vmem>>, %arg3: memref<1x128xf32, #tpu.memory_space<vmem>>, %arg4: memref<288x128xbf16, #tpu.memory_space<vmem>>) attributes {dimension_semantics = [#tpu.dimension_semantics<parallel>], iteration_bounds = array<i64: 1>, scalar_prefetch = 0 : i64, scratch_operands = 0 : i64, tpu.core_type = #tpu.core_type<tc>, window_params = [{transform_indices = @transform_0, window_bounds = array<i64: 4, 288, 128>}, {pipeline_mode = #tpu.pipeline_mode<synchronous>, transform_indices = @transform_1, window_bounds = array<i64: 128, 128>}, {pipeline_mode = #tpu.pipeline_mode<synchronous>, transform_indices = @transform_2, window_bounds = array<i64: 1, 128>}, {transform_indices = @transform_3, window_bounds = array<i64: 288, 128>}]} {
    %c0 = arith.constant 0 : index
    %c0_0 = arith.constant 0 : index
    %c0_1 = arith.constant 0 : index
    %0 = vector.load %arg1[%c0, %c0_0, %c0_1] : memref<4x288x128xbf16, #tpu.memory_space<vmem>>, vector<4x288x128xbf16>
    %1 = vector.shape_cast %0 : vector<4x288x128xbf16> to vector<1152x128xbf16>
    %c0_2 = arith.constant 0 : index
    %c0_3 = arith.constant 0 : index
    %2 = vector.load %arg2[%c0_2, %c0_3] : memref<128x128xbf16, #tpu.memory_space<vmem>>, vector<128x128xbf16>
    %cst = arith.constant dense<0.000000e+00> : vector<1152x128xf32>
    %3 = tpu.matmul %1, %2, %cst {dimension_numbers = #tpu.dot_dimension_numbers<[1], [0], [0], [1], [0, 0, 1, 1], [], []>} : vector<1152x128xbf16>, vector<128x128xbf16>, vector<1152x128xf32> -> vector<1152x128xf32>
    %4 = vector.shape_cast %3 : vector<1152x128xf32> to vector<4x288x128xf32>
    %cst_4 = arith.constant dense<0xFF800000> : vector<288x128xf32>
    %5 = vector.multi_reduction <maximumf>, %4, %cst_4 [0] : vector<4x288x128xf32> to vector<288x128xf32>
    %c0_5 = arith.constant 0 : index
    %c0_6 = arith.constant 0 : index
    %6 = vector.load %arg3[%c0_5, %c0_6] : memref<1x128xf32, #tpu.memory_space<vmem>>, vector<1x128xf32>
    %7 = vector.broadcast %6 : vector<1x128xf32> to vector<288x128xf32>
    %8 = arith.addf %5, %7 : vector<288x128xf32>
    %cst_7 = arith.constant 0.000000e+00 : f32
    %9 = vector.broadcast %cst_7 : f32 to vector<288x128xf32>
    %10 = arith.maximumf %8, %9 : vector<288x128xf32>
    %11 = arith.truncf %10 : vector<288x128xf32> to vector<288x128xbf16>
    %c0_8 = arith.constant 0 : index
    %c0_9 = arith.constant 0 : index
    %12 = vector.load %arg4[%c0_8, %c0_9] : memref<288x128xbf16, #tpu.memory_space<vmem>>, vector<288x128xbf16>
    tpu.vector_store %arg4[%c0_8, %c0_9], %11 {strides = array<i32>} : memref<288x128xbf16, #tpu.memory_space<vmem>>, vector<288x128xbf16>,
    return
  }
  func.func @transform_0(%arg0: i32) -> (i32, i32, i32) {
    %c0_i32 = arith.constant 0 : i32
    %c0_i32_0 = arith.constant 0 : i32
    %c0_i32_1 = arith.constant 0 : i32
    return %c0_i32, %arg0, %c0_i32_0 : i32, i32, i32
  }
  func.func @transform_1(%arg0: i32) -> (i32, i32) {
    %c0_i32 = arith.constant 0 : i32
    %c0_i32_0 = arith.constant 0 : i32
    %c0_i32_1 = arith.constant 0 : i32
    return %c0_i32, %c0_i32_0 : i32, i32
  }
  func.func @transform_2(%arg0: i32) -> (i32, i32) {
    %c0_i32 = arith.constant 0 : i32
    %c0_i32_0 = arith.constant 0 : i32
    %c0_i32_1 = arith.constant 0 : i32
    return %c0_i32, %c0_i32_0 : i32, i32
  }
  func.func @transform_3(%arg0: i32) -> (i32, i32) {
    %c0_i32 = arith.constant 0 : i32
    %c0_i32_0 = arith.constant 0 : i32
    return %arg0, %c0_i32 : i32, i32
  }
}

module attributes {stable_mosaic.version = 11 : i64} {
  func.func @_conv2_fc_head_kernel(%arg0: i32, %arg1: memref<4x32x256xbf16, #tpu.memory_space<vmem>>, %arg2: memref<256x128xbf16, #tpu.memory_space<vmem>>, %arg3: memref<1x128xf32, #tpu.memory_space<vmem>>, %arg4: memref<16x128x128xbf16, #tpu.memory_space<vmem>>, %arg5: memref<1x128xf32, #tpu.memory_space<vmem>>, %arg6: memref<128x128xbf16, #tpu.memory_space<vmem>>, %arg7: memref<1x128xf32, #tpu.memory_space<vmem>>, %arg8: memref<128x128xbf16, #tpu.memory_space<vmem>>, %arg9: memref<1x128xf32, #tpu.memory_space<vmem>>, %arg10: memref<128x128xbf16, #tpu.memory_space<vmem>>, %arg11: memref<1x128xf32, #tpu.memory_space<vmem>>, %arg12: memref<128x128xbf16, #tpu.memory_space<vmem>>, %arg13: memref<1x128xf32, #tpu.memory_space<vmem>>, %arg14: memref<2x128xf32, #tpu.memory_space<vmem>>) attributes {dimension_semantics = [#tpu.dimension_semantics<parallel>], iteration_bounds = array<i64: 1>, scalar_prefetch = 0 : i64, scratch_operands = 0 : i64, tpu.core_type = #tpu.core_type<tc>, window_params = [{transform_indices = @transform_0, window_bounds = array<i64: 4, 32, 256>}, {pipeline_mode = #tpu.pipeline_mode<synchronous>, transform_indices = @transform_1, window_bounds = array<i64: 256, 128>}, {pipeline_mode = #tpu.pipeline_mode<synchronous>, transform_indices = @transform_2, window_bounds = array<i64: 1, 128>}, {pipeline_mode = #tpu.pipeline_mode<synchronous>, transform_indices = @transform_3, window_bounds = array<i64: 16, 128, 128>}, {pipeline_mode = #tpu.pipeline_mode<synchronous>, transform_indices = @transform_4, window_bounds = array<i64: 1, 128>}, {pipeline_mode = #tpu.pipeline_mode<synchronous>, transform_indices = @transform_5, window_bounds = array<i64: 128, 128>}, {pipeline_mode = #tpu.pipeline_mode<synchronous>, transform_indices = @transform_6, window_bounds = array<i64: 1, 128>}, {pipeline_mode = #tpu.pipeline_mode<synchronous>, transform_indices = @transform_7, window_bounds = array<i64: 128, 128>}, {pipeline_mode = #tpu.pipeline_mode<synchronous>, transform_indices = @transform_8, window_bounds = array<i64: 1, 128>}, {pipeline_mode = #tpu.pipeline_mode<synchronous>, transform_indices = @transform_9, window_bounds = array<i64: 128, 128>}, {pipeline_mode = #tpu.pipeline_mode<synchronous>, transform_indices = @transform_10, window_bounds = array<i64: 1, 128>}, {pipeline_mode = #tpu.pipeline_mode<synchronous>, transform_indices = @transform_11, window_bounds = array<i64: 128, 128>}, {pipeline_mode = #tpu.pipeline_mode<synchronous>, transform_indices = @transform_12, window_bounds = array<i64: 1, 128>}, {transform_indices = @transform_13, window_bounds = array<i64: 2, 128>}]} {
    %c0 = arith.constant 0 : index
    %c0_0 = arith.constant 0 : index
    %c0_1 = arith.constant 0 : index
    %0 = vector.load %arg1[%c0, %c0_0, %c0_1] : memref<4x32x256xbf16, #tpu.memory_space<vmem>>, vector<4x32x256xbf16>
    %1 = vector.shape_cast %0 : vector<4x32x256xbf16> to vector<128x256xbf16>
    %c0_2 = arith.constant 0 : index
    %c0_3 = arith.constant 0 : index
    %2 = vector.load %arg2[%c0_2, %c0_3] : memref<256x128xbf16, #tpu.memory_space<vmem>>, vector<256x128xbf16>
    %cst = arith.constant dense<0.000000e+00> : vector<128x128xf32>
    %3 = tpu.matmul %1, %2, %cst {dimension_numbers = #tpu.dot_dimension_numbers<[1], [0], [0], [1], [0, 0, 1, 1], [], []>} : vector<128x256xbf16>, vector<256x128xbf16>, vector<128x128xf32> -> vector<128x128xf32>
    %4 = vector.shape_cast %3 : vector<128x128xf32> to vector<4x32x128xf32>
    %cst_4 = arith.constant dense<0xFF800000> : vector<32x128xf32>
    %5 = vector.multi_reduction <maximumf>, %4, %cst_4 [0] : vector<4x32x128xf32> to vector<32x128xf32>
    %c0_5 = arith.constant 0 : index
    %c0_6 = arith.constant 0 : index
    %6 = vector.load %arg3[%c0_5, %c0_6] : memref<1x128xf32, #tpu.memory_space<vmem>>, vector<1x128xf32>
    %7 = vector.broadcast %6 : vector<1x128xf32> to vector<32x128xf32>
    %8 = arith.addf %5, %7 : vector<32x128xf32>
    %cst_7 = arith.constant 0.000000e+00 : f32
    %9 = vector.broadcast %cst_7 : f32 to vector<32x128xf32>
    %10 = arith.maximumf %8, %9 : vector<32x128xf32>
    %11 = arith.truncf %10 : vector<32x128xf32> to vector<32x128xbf16>
    %12 = vector.shape_cast %11 : vector<32x128xbf16> to vector<2x16x128xbf16>
    %cst_8 = arith.constant 0.000000e+00 : f32
    %13 = vector.broadcast %cst_8 : f32 to vector<2x128xf32>
    %14 = vector.extract_strided_slice %12 {offsets = [0, 0, 0], sizes = [2, 1, 128], strides = [1, 1, 1]} : vector<2x16x128xbf16> to vector<2x1x128xbf16>
    %15 = vector.shape_cast %14 : vector<2x1x128xbf16> to vector<2x128xbf16>
    %c0_9 = arith.constant 0 : index
    %c0_10 = arith.constant 0 : index
    %c0_11 = arith.constant 0 : index
    %16 = vector.load %arg4[%c0_9, %c0_10, %c0_11] : memref<16x128x128xbf16, #tpu.memory_space<vmem>>, vector<1x128x128xbf16>
    %17 = vector.shape_cast %16 : vector<1x128x128xbf16> to vector<128x128xbf16>
    %cst_12 = arith.constant dense<0.000000e+00> : vector<2x128xf32>
    %18 = tpu.matmul %15, %17, %cst_12 {dimension_numbers = #tpu.dot_dimension_numbers<[1], [0], [0], [1], [0, 0, 1, 1], [], []>} : vector<2x128xbf16>, vector<128x128xbf16>, vector<2x128xf32> -> vector<2x128xf32>
    %19 = arith.addf %13, %18 : vector<2x128xf32>
    %20 = vector.extract_strided_slice %12 {offsets = [0, 1, 0], sizes = [2, 1, 128], strides = [1, 1, 1]} : vector<2x16x128xbf16> to vector<2x1x128xbf16>
    %21 = vector.shape_cast %20 : vector<2x1x128xbf16> to vector<2x128xbf16>
    %c1 = arith.constant 1 : index
    %c0_13 = arith.constant 0 : index
    %c0_14 = arith.constant 0 : index
    %22 = vector.load %arg4[%c1, %c0_13, %c0_14] : memref<16x128x128xbf16, #tpu.memory_space<vmem>>, vector<1x128x128xbf16>
    %23 = vector.shape_cast %22 : vector<1x128x128xbf16> to vector<128x128xbf16>
    %cst_15 = arith.constant dense<0.000000e+00> : vector<2x128xf32>
    %24 = tpu.matmul %21, %23, %cst_15 {dimension_numbers = #tpu.dot_dimension_numbers<[1], [0], [0], [1], [0, 0, 1, 1], [], []>} : vector<2x128xbf16>, vector<128x128xbf16>, vector<2x128xf32> -> vector<2x128xf32>
    %25 = arith.addf %19, %24 : vector<2x128xf32>
    %26 = vector.extract_strided_slice %12 {offsets = [0, 2, 0], sizes = [2, 1, 128], strides = [1, 1, 1]} : vector<2x16x128xbf16> to vector<2x1x128xbf16>
    %27 = vector.shape_cast %26 : vector<2x1x128xbf16> to vector<2x128xbf16>
    %c2 = arith.constant 2 : index
    %c0_16 = arith.constant 0 : index
    %c0_17 = arith.constant 0 : index
    %28 = vector.load %arg4[%c2, %c0_16, %c0_17] : memref<16x128x128xbf16, #tpu.memory_space<vmem>>, vector<1x128x128xbf16>
    %29 = vector.shape_cast %28 : vector<1x128x128xbf16> to vector<128x128xbf16>
    %cst_18 = arith.constant dense<0.000000e+00> : vector<2x128xf32>
    %30 = tpu.matmul %27, %29, %cst_18 {dimension_numbers = #tpu.dot_dimension_numbers<[1], [0], [0], [1], [0, 0, 1, 1], [], []>} : vector<2x128xbf16>, vector<128x128xbf16>, vector<2x128xf32> -> vector<2x128xf32>
    %31 = arith.addf %25, %30 : vector<2x128xf32>
    %32 = vector.extract_strided_slice %12 {offsets = [0, 3, 0], sizes = [2, 1, 128], strides = [1, 1, 1]} : vector<2x16x128xbf16> to vector<2x1x128xbf16>
    %33 = vector.shape_cast %32 : vector<2x1x128xbf16> to vector<2x128xbf16>
    %c3 = arith.constant 3 : index
    %c0_19 = arith.constant 0 : index
    %c0_20 = arith.constant 0 : index
    %34 = vector.load %arg4[%c3, %c0_19, %c0_20] : memref<16x128x128xbf16, #tpu.memory_space<vmem>>, vector<1x128x128xbf16>
    %35 = vector.shape_cast %34 : vector<1x128x128xbf16> to vector<128x128xbf16>
    %cst_21 = arith.constant dense<0.000000e+00> : vector<2x128xf32>
    %36 = tpu.matmul %33, %35, %cst_21 {dimension_numbers = #tpu.dot_dimension_numbers<[1], [0], [0], [1], [0, 0, 1, 1], [], []>} : vector<2x128xbf16>, vector<128x128xbf16>, vector<2x128xf32> -> vector<2x128xf32>
    %37 = arith.addf %31, %36 : vector<2x128xf32>
    %38 = vector.extract_strided_slice %12 {offsets = [0, 4, 0], sizes = [2, 1, 128], strides = [1, 1, 1]} : vector<2x16x128xbf16> to vector<2x1x128xbf16>
    %39 = vector.shape_cast %38 : vector<2x1x128xbf16> to vector<2x128xbf16>
    %c4 = arith.constant 4 : index
    %c0_22 = arith.constant 0 : index
    %c0_23 = arith.constant 0 : index
    %40 = vector.load %arg4[%c4, %c0_22, %c0_23] : memref<16x128x128xbf16, #tpu.memory_space<vmem>>, vector<1x128x128xbf16>
    %41 = vector.shape_cast %40 : vector<1x128x128xbf16> to vector<128x128xbf16>
    %cst_24 = arith.constant dense<0.000000e+00> : vector<2x128xf32>
    %42 = tpu.matmul %39, %41, %cst_24 {dimension_numbers = #tpu.dot_dimension_numbers<[1], [0], [0], [1], [0, 0, 1, 1], [], []>} : vector<2x128xbf16>, vector<128x128xbf16>, vector<2x128xf32> -> vector<2x128xf32>
    %43 = arith.addf %37, %42 : vector<2x128xf32>
    %44 = vector.extract_strided_slice %12 {offsets = [0, 5, 0], sizes = [2, 1, 128], strides = [1, 1, 1]} : vector<2x16x128xbf16> to vector<2x1x128xbf16>
    %45 = vector.shape_cast %44 : vector<2x1x128xbf16> to vector<2x128xbf16>
    %c5 = arith.constant 5 : index
    %c0_25 = arith.constant 0 : index
    %c0_26 = arith.constant 0 : index
    %46 = vector.load %arg4[%c5, %c0_25, %c0_26] : memref<16x128x128xbf16, #tpu.memory_space<vmem>>, vector<1x128x128xbf16>
    %47 = vector.shape_cast %46 : vector<1x128x128xbf16> to vector<128x128xbf16>
    %cst_27 = arith.constant dense<0.000000e+00> : vector<2x128xf32>
    %48 = tpu.matmul %45, %47, %cst_27 {dimension_numbers = #tpu.dot_dimension_numbers<[1], [0], [0], [1], [0, 0, 1, 1], [], []>} : vector<2x128xbf16>, vector<128x128xbf16>, vector<2x128xf32> -> vector<2x128xf32>
    %49 = arith.addf %43, %48 : vector<2x128xf32>
    %50 = vector.extract_strided_slice %12 {offsets = [0, 6, 0], sizes = [2, 1, 128], strides = [1, 1, 1]} : vector<2x16x128xbf16> to vector<2x1x128xbf16>
    %51 = vector.shape_cast %50 : vector<2x1x128xbf16> to vector<2x128xbf16>
    %c6 = arith.constant 6 : index
    %c0_28 = arith.constant 0 : index
    %c0_29 = arith.constant 0 : index
    %52 = vector.load %arg4[%c6, %c0_28, %c0_29] : memref<16x128x128xbf16, #tpu.memory_space<vmem>>, vector<1x128x128xbf16>
    %53 = vector.shape_cast %52 : vector<1x128x128xbf16> to vector<128x128xbf16>
    %cst_30 = arith.constant dense<0.000000e+00> : vector<2x128xf32>
    %54 = tpu.matmul %51, %53, %cst_30 {dimension_numbers = #tpu.dot_dimension_numbers<[1], [0], [0], [1], [0, 0, 1, 1], [], []>} : vector<2x128xbf16>, vector<128x128xbf16>, vector<2x128xf32> -> vector<2x128xf32>
    %55 = arith.addf %49, %54 : vector<2x128xf32>
    %56 = vector.extract_strided_slice %12 {offsets = [0, 7, 0], sizes = [2, 1, 128], strides = [1, 1, 1]} : vector<2x16x128xbf16> to vector<2x1x128xbf16>
    %57 = vector.shape_cast %56 : vector<2x1x128xbf16> to vector<2x128xbf16>
    %c7 = arith.constant 7 : index
    %c0_31 = arith.constant 0 : index
    %c0_32 = arith.constant 0 : index
    %58 = vector.load %arg4[%c7, %c0_31, %c0_32] : memref<16x128x128xbf16, #tpu.memory_space<vmem>>, vector<1x128x128xbf16>
    %59 = vector.shape_cast %58 : vector<1x128x128xbf16> to vector<128x128xbf16>
    %cst_33 = arith.constant dense<0.000000e+00> : vector<2x128xf32>
    %60 = tpu.matmul %57, %59, %cst_33 {dimension_numbers = #tpu.dot_dimension_numbers<[1], [0], [0], [1], [0, 0, 1, 1], [], []>} : vector<2x128xbf16>, vector<128x128xbf16>, vector<2x128xf32> -> vector<2x128xf32>
    %61 = arith.addf %55, %60 : vector<2x128xf32>
    %62 = vector.extract_strided_slice %12 {offsets = [0, 8, 0], sizes = [2, 1, 128], strides = [1, 1, 1]} : vector<2x16x128xbf16> to vector<2x1x128xbf16>
    %63 = vector.shape_cast %62 : vector<2x1x128xbf16> to vector<2x128xbf16>
    %c8 = arith.constant 8 : index
    %c0_34 = arith.constant 0 : index
    %c0_35 = arith.constant 0 : index
    %64 = vector.load %arg4[%c8, %c0_34, %c0_35] : memref<16x128x128xbf16, #tpu.memory_space<vmem>>, vector<1x128x128xbf16>
    %65 = vector.shape_cast %64 : vector<1x128x128xbf16> to vector<128x128xbf16>
    %cst_36 = arith.constant dense<0.000000e+00> : vector<2x128xf32>
    %66 = tpu.matmul %63, %65, %cst_36 {dimension_numbers = #tpu.dot_dimension_numbers<[1], [0], [0], [1], [0, 0, 1, 1], [], []>} : vector<2x128xbf16>, vector<128x128xbf16>, vector<2x128xf32> -> vector<2x128xf32>
    %67 = arith.addf %61, %66 : vector<2x128xf32>
    %68 = vector.extract_strided_slice %12 {offsets = [0, 9, 0], sizes = [2, 1, 128], strides = [1, 1, 1]} : vector<2x16x128xbf16> to vector<2x1x128xbf16>
    %69 = vector.shape_cast %68 : vector<2x1x128xbf16> to vector<2x128xbf16>
    %c9 = arith.constant 9 : index
    %c0_37 = arith.constant 0 : index
    %c0_38 = arith.constant 0 : index
    %70 = vector.load %arg4[%c9, %c0_37, %c0_38] : memref<16x128x128xbf16, #tpu.memory_space<vmem>>, vector<1x128x128xbf16>
    %71 = vector.shape_cast %70 : vector<1x128x128xbf16> to vector<128x128xbf16>
    %cst_39 = arith.constant dense<0.000000e+00> : vector<2x128xf32>
    %72 = tpu.matmul %69, %71, %cst_39 {dimension_numbers = #tpu.dot_dimension_numbers<[1], [0], [0], [1], [0, 0, 1, 1], [], []>} : vector<2x128xbf16>, vector<128x128xbf16>, vector<2x128xf32> -> vector<2x128xf32>
    %73 = arith.addf %67, %72 : vector<2x128xf32>
    %74 = vector.extract_strided_slice %12 {offsets = [0, 10, 0], sizes = [2, 1, 128], strides = [1, 1, 1]} : vector<2x16x128xbf16> to vector<2x1x128xbf16>
    %75 = vector.shape_cast %74 : vector<2x1x128xbf16> to vector<2x128xbf16>
    %c10 = arith.constant 10 : index
    %c0_40 = arith.constant 0 : index
    %c0_41 = arith.constant 0 : index
    %76 = vector.load %arg4[%c10, %c0_40, %c0_41] : memref<16x128x128xbf16, #tpu.memory_space<vmem>>, vector<1x128x128xbf16>
    %77 = vector.shape_cast %76 : vector<1x128x128xbf16> to vector<128x128xbf16>
    %cst_42 = arith.constant dense<0.000000e+00> : vector<2x128xf32>
    %78 = tpu.matmul %75, %77, %cst_42 {dimension_numbers = #tpu.dot_dimension_numbers<[1], [0], [0], [1], [0, 0, 1, 1], [], []>} : vector<2x128xbf16>, vector<128x128xbf16>, vector<2x128xf32> -> vector<2x128xf32>
    %79 = arith.addf %73, %78 : vector<2x128xf32>
    %80 = vector.extract_strided_slice %12 {offsets = [0, 11, 0], sizes = [2, 1, 128], strides = [1, 1, 1]} : vector<2x16x128xbf16> to vector<2x1x128xbf16>
    %81 = vector.shape_cast %80 : vector<2x1x128xbf16> to vector<2x128xbf16>
    %c11 = arith.constant 11 : index
    %c0_43 = arith.constant 0 : index
    %c0_44 = arith.constant 0 : index
    %82 = vector.load %arg4[%c11, %c0_43, %c0_44] : memref<16x128x128xbf16, #tpu.memory_space<vmem>>, vector<1x128x128xbf16>
    %83 = vector.shape_cast %82 : vector<1x128x128xbf16> to vector<128x128xbf16>
    %cst_45 = arith.constant dense<0.000000e+00> : vector<2x128xf32>
    %84 = tpu.matmul %81, %83, %cst_45 {dimension_numbers = #tpu.dot_dimension_numbers<[1], [0], [0], [1], [0, 0, 1, 1], [], []>} : vector<2x128xbf16>, vector<128x128xbf16>, vector<2x128xf32> -> vector<2x128xf32>
    %85 = arith.addf %79, %84 : vector<2x128xf32>
    %86 = vector.extract_strided_slice %12 {offsets = [0, 12, 0], sizes = [2, 1, 128], strides = [1, 1, 1]} : vector<2x16x128xbf16> to vector<2x1x128xbf16>
    %87 = vector.shape_cast %86 : vector<2x1x128xbf16> to vector<2x128xbf16>
    %c12 = arith.constant 12 : index
    %c0_46 = arith.constant 0 : index
    %c0_47 = arith.constant 0 : index
    %88 = vector.load %arg4[%c12, %c0_46, %c0_47] : memref<16x128x128xbf16, #tpu.memory_space<vmem>>, vector<1x128x128xbf16>
    %89 = vector.shape_cast %88 : vector<1x128x128xbf16> to vector<128x128xbf16>
    %cst_48 = arith.constant dense<0.000000e+00> : vector<2x128xf32>
    %90 = tpu.matmul %87, %89, %cst_48 {dimension_numbers = #tpu.dot_dimension_numbers<[1], [0], [0], [1], [0, 0, 1, 1], [], []>} : vector<2x128xbf16>, vector<128x128xbf16>, vector<2x128xf32> -> vector<2x128xf32>
    %91 = arith.addf %85, %90 : vector<2x128xf32>
    %92 = vector.extract_strided_slice %12 {offsets = [0, 13, 0], sizes = [2, 1, 128], strides = [1, 1, 1]} : vector<2x16x128xbf16> to vector<2x1x128xbf16>
    %93 = vector.shape_cast %92 : vector<2x1x128xbf16> to vector<2x128xbf16>
    %c13 = arith.constant 13 : index
    %c0_49 = arith.constant 0 : index
    %c0_50 = arith.constant 0 : index
    %94 = vector.load %arg4[%c13, %c0_49, %c0_50] : memref<16x128x128xbf16, #tpu.memory_space<vmem>>, vector<1x128x128xbf16>
    %95 = vector.shape_cast %94 : vector<1x128x128xbf16> to vector<128x128xbf16>
    %cst_51 = arith.constant dense<0.000000e+00> : vector<2x128xf32>
    %96 = tpu.matmul %93, %95, %cst_51 {dimension_numbers = #tpu.dot_dimension_numbers<[1], [0], [0], [1], [0, 0, 1, 1], [], []>} : vector<2x128xbf16>, vector<128x128xbf16>, vector<2x128xf32> -> vector<2x128xf32>
    %97 = arith.addf %91, %96 : vector<2x128xf32>
    %98 = vector.extract_strided_slice %12 {offsets = [0, 14, 0], sizes = [2, 1, 128], strides = [1, 1, 1]} : vector<2x16x128xbf16> to vector<2x1x128xbf16>
    %99 = vector.shape_cast %98 : vector<2x1x128xbf16> to vector<2x128xbf16>
    %c14 = arith.constant 14 : index
    %c0_52 = arith.constant 0 : index
    %c0_53 = arith.constant 0 : index
    %100 = vector.load %arg4[%c14, %c0_52, %c0_53] : memref<16x128x128xbf16, #tpu.memory_space<vmem>>, vector<1x128x128xbf16>
    %101 = vector.shape_cast %100 : vector<1x128x128xbf16> to vector<128x128xbf16>
    %cst_54 = arith.constant dense<0.000000e+00> : vector<2x128xf32>
    %102 = tpu.matmul %99, %101, %cst_54 {dimension_numbers = #tpu.dot_dimension_numbers<[1], [0], [0], [1], [0, 0, 1, 1], [], []>} : vector<2x128xbf16>, vector<128x128xbf16>, vector<2x128xf32> -> vector<2x128xf32>
    %103 = arith.addf %97, %102 : vector<2x128xf32>
    %104 = vector.extract_strided_slice %12 {offsets = [0, 15, 0], sizes = [2, 1, 128], strides = [1, 1, 1]} : vector<2x16x128xbf16> to vector<2x1x128xbf16>
    %105 = vector.shape_cast %104 : vector<2x1x128xbf16> to vector<2x128xbf16>
    %c15 = arith.constant 15 : index
    %c0_55 = arith.constant 0 : index
    %c0_56 = arith.constant 0 : index
    %106 = vector.load %arg4[%c15, %c0_55, %c0_56] : memref<16x128x128xbf16, #tpu.memory_space<vmem>>, vector<1x128x128xbf16>
    %107 = vector.shape_cast %106 : vector<1x128x128xbf16> to vector<128x128xbf16>
    %cst_57 = arith.constant dense<0.000000e+00> : vector<2x128xf32>
    %108 = tpu.matmul %105, %107, %cst_57 {dimension_numbers = #tpu.dot_dimension_numbers<[1], [0], [0], [1], [0, 0, 1, 1], [], []>} : vector<2x128xbf16>, vector<128x128xbf16>, vector<2x128xf32> -> vector<2x128xf32>
    %109 = arith.addf %103, %108 : vector<2x128xf32>
    %c0_58 = arith.constant 0 : index
    %c0_59 = arith.constant 0 : index
    %110 = vector.load %arg5[%c0_58, %c0_59] : memref<1x128xf32, #tpu.memory_space<vmem>>, vector<1x128xf32>
    %111 = vector.broadcast %110 : vector<1x128xf32> to vector<2x128xf32>
    %112 = arith.addf %109, %111 : vector<2x128xf32>
    %cst_60 = arith.constant 0.000000e+00 : f32
    %113 = vector.broadcast %cst_60 : f32 to vector<2x128xf32>
    %114 = arith.maximumf %112, %113 : vector<2x128xf32>
    %115 = arith.truncf %114 : vector<2x128xf32> to vector<2x128xbf16>
    %c0_61 = arith.constant 0 : index
    %c0_62 = arith.constant 0 : index
    %116 = vector.load %arg6[%c0_61, %c0_62] : memref<128x128xbf16, #tpu.memory_space<vmem>>, vector<128x128xbf16>
    %cst_63 = arith.constant dense<0.000000e+00> : vector<2x128xf32>
    %117 = tpu.matmul %115, %116, %cst_63 {dimension_numbers = #tpu.dot_dimension_numbers<[1], [0], [0], [1], [0, 0, 1, 1], [], []>} : vector<2x128xbf16>, vector<128x128xbf16>, vector<2x128xf32> -> vector<2x128xf32>
    %c0_64 = arith.constant 0 : index
    %c0_65 = arith.constant 0 : index
    %118 = vector.load %arg7[%c0_64, %c0_65] : memref<1x128xf32, #tpu.memory_space<vmem>>, vector<1x128xf32>
    %119 = vector.broadcast %118 : vector<1x128xf32> to vector<2x128xf32>
    %120 = arith.addf %117, %119 : vector<2x128xf32>
    %cst_66 = arith.constant 0.000000e+00 : f32
    %121 = vector.broadcast %cst_66 : f32 to vector<2x128xf32>
    %122 = arith.maximumf %120, %121 : vector<2x128xf32>
    %123 = arith.truncf %122 : vector<2x128xf32> to vector<2x128xbf16>
    %c0_67 = arith.constant 0 : index
    %c0_68 = arith.constant 0 : index
    %124 = vector.load %arg8[%c0_67, %c0_68] : memref<128x128xbf16, #tpu.memory_space<vmem>>, vector<128x128xbf16>
    %cst_69 = arith.constant dense<0.000000e+00> : vector<2x128xf32>
    %125 = tpu.matmul %123, %124, %cst_69 {dimension_numbers = #tpu.dot_dimension_numbers<[1], [0], [0], [1], [0, 0, 1, 1], [], []>} : vector<2x128xbf16>, vector<128x128xbf16>, vector<2x128xf32> -> vector<2x128xf32>
    %c0_70 = arith.constant 0 : index
    %c0_71 = arith.constant 0 : index
    %126 = vector.load %arg9[%c0_70, %c0_71] : memref<1x128xf32, #tpu.memory_space<vmem>>, vector<1x128xf32>
    %127 = vector.broadcast %126 : vector<1x128xf32> to vector<2x128xf32>
    %128 = arith.addf %125, %127 : vector<2x128xf32>
    %cst_72 = arith.constant 0.000000e+00 : f32
    %129 = vector.broadcast %cst_72 : f32 to vector<2x128xf32>
    %130 = arith.maximumf %128, %129 : vector<2x128xf32>
    %131 = arith.truncf %130 : vector<2x128xf32> to vector<2x128xbf16>
    %c0_73 = arith.constant 0 : index
    %c0_74 = arith.constant 0 : index
    %132 = vector.load %arg10[%c0_73, %c0_74] : memref<128x128xbf16, #tpu.memory_space<vmem>>, vector<128x128xbf16>
    %cst_75 = arith.constant dense<0.000000e+00> : vector<2x128xf32>
    %133 = tpu.matmul %131, %132, %cst_75 {dimension_numbers = #tpu.dot_dimension_numbers<[1], [0], [0], [1], [0, 0, 1, 1], [], []>} : vector<2x128xbf16>, vector<128x128xbf16>, vector<2x128xf32> -> vector<2x128xf32>
    %c0_76 = arith.constant 0 : index
    %c0_77 = arith.constant 0 : index
    %134 = vector.load %arg11[%c0_76, %c0_77] : memref<1x128xf32, #tpu.memory_space<vmem>>, vector<1x128xf32>
    %135 = vector.broadcast %134 : vector<1x128xf32> to vector<2x128xf32>
    %136 = arith.addf %133, %135 : vector<2x128xf32>
    %cst_78 = arith.constant 0.000000e+00 : f32
    %137 = vector.broadcast %cst_78 : f32 to vector<2x128xf32>
    %138 = arith.maximumf %136, %137 : vector<2x128xf32>
    %139 = arith.truncf %138 : vector<2x128xf32> to vector<2x128xbf16>
    %c0_79 = arith.constant 0 : index
    %c0_80 = arith.constant 0 : index
    %140 = vector.load %arg12[%c0_79, %c0_80] : memref<128x128xbf16, #tpu.memory_space<vmem>>, vector<128x128xbf16>
    %cst_81 = arith.constant dense<0.000000e+00> : vector<2x128xf32>
    %141 = tpu.matmul %139, %140, %cst_81 {dimension_numbers = #tpu.dot_dimension_numbers<[1], [0], [0], [1], [0, 0, 1, 1], [], []>} : vector<2x128xbf16>, vector<128x128xbf16>, vector<2x128xf32> -> vector<2x128xf32>
    %c0_82 = arith.constant 0 : index
    %c0_83 = arith.constant 0 : index
    %142 = vector.load %arg13[%c0_82, %c0_83] : memref<1x128xf32, #tpu.memory_space<vmem>>, vector<1x128xf32>
    %143 = vector.broadcast %142 : vector<1x128xf32> to vector<2x128xf32>
    %144 = arith.addf %141, %143 : vector<2x128xf32>
    %c0_84 = arith.constant 0 : index
    %c0_85 = arith.constant 0 : index
    %145 = vector.load %arg14[%c0_84, %c0_85] : memref<2x128xf32, #tpu.memory_space<vmem>>, vector<2x128xf32>
    tpu.vector_store %arg14[%c0_84, %c0_85], %144 {strides = array<i32>} : memref<2x128xf32, #tpu.memory_space<vmem>>, vector<2x128xf32>,
    return
  }
  func.func @transform_0(%arg0: i32) -> (i32, i32, i32) {
    %c0_i32 = arith.constant 0 : i32
    %c0_i32_0 = arith.constant 0 : i32
    %c0_i32_1 = arith.constant 0 : i32
    return %c0_i32, %arg0, %c0_i32_0 : i32, i32, i32
  }
  func.func @transform_1(%arg0: i32) -> (i32, i32) {
    %c0_i32 = arith.constant 0 : i32
    %c0_i32_0 = arith.constant 0 : i32
    %c0_i32_1 = arith.constant 0 : i32
    return %c0_i32, %c0_i32_0 : i32, i32
  }
  func.func @transform_2(%arg0: i32) -> (i32, i32) {
    %c0_i32 = arith.constant 0 : i32
    %c0_i32_0 = arith.constant 0 : i32
    %c0_i32_1 = arith.constant 0 : i32
    return %c0_i32, %c0_i32_0 : i32, i32
  }
  func.func @transform_3(%arg0: i32) -> (i32, i32, i32) {
    %c0_i32 = arith.constant 0 : i32
    %c0_i32_0 = arith.constant 0 : i32
    %c0_i32_1 = arith.constant 0 : i32
    %c0_i32_2 = arith.constant 0 : i32
    return %c0_i32, %c0_i32_0, %c0_i32_1 : i32, i32, i32
  }
  func.func @transform_4(%arg0: i32) -> (i32, i32) {
    %c0_i32 = arith.constant 0 : i32
    %c0_i32_0 = arith.constant 0 : i32
    %c0_i32_1 = arith.constant 0 : i32
    return %c0_i32, %c0_i32_0 : i32, i32
  }
  func.func @transform_5(%arg0: i32) -> (i32, i32) {
    %c0_i32 = arith.constant 0 : i32
    %c0_i32_0 = arith.constant 0 : i32
    %c0_i32_1 = arith.constant 0 : i32
    return %c0_i32, %c0_i32_0 : i32, i32
  }
  func.func @transform_6(%arg0: i32) -> (i32, i32) {
    %c0_i32 = arith.constant 0 : i32
    %c0_i32_0 = arith.constant 0 : i32
    %c0_i32_1 = arith.constant 0 : i32
    return %c0_i32, %c0_i32_0 : i32, i32
  }
  func.func @transform_7(%arg0: i32) -> (i32, i32) {
    %c0_i32 = arith.constant 0 : i32
    %c0_i32_0 = arith.constant 0 : i32
    %c0_i32_1 = arith.constant 0 : i32
    return %c0_i32, %c0_i32_0 : i32, i32
  }
  func.func @transform_8(%arg0: i32) -> (i32, i32) {
    %c0_i32 = arith.constant 0 : i32
    %c0_i32_0 = arith.constant 0 : i32
    %c0_i32_1 = arith.constant 0 : i32
    return %c0_i32, %c0_i32_0 : i32, i32
  }
  func.func @transform_9(%arg0: i32) -> (i32, i32) {
    %c0_i32 = arith.constant 0 : i32
    %c0_i32_0 = arith.constant 0 : i32
    %c0_i32_1 = arith.constant 0 : i32
    return %c0_i32, %c0_i32_0 : i32, i32
  }
  func.func @transform_10(%arg0: i32) -> (i32, i32) {
    %c0_i32 = arith.constant 0 : i32
    %c0_i32_0 = arith.constant 0 : i32
    %c0_i32_1 = arith.constant 0 : i32
    return %c0_i32, %c0_i32_0 : i32, i32
  }
  func.func @transform_11(%arg0: i32) -> (i32, i32) {
    %c0_i32 = arith.constant 0 : i32
    %c0_i32_0 = arith.constant 0 : i32
    %c0_i32_1 = arith.constant 0 : i32
    return %c0_i32, %c0_i32_0 : i32, i32
  }
  func.func @transform_12(%arg0: i32) -> (i32, i32) {
    %c0_i32 = arith.constant 0 : i32
    %c0_i32_0 = arith.constant 0 : i32
    %c0_i32_1 = arith.constant 0 : i32
    return %c0_i32, %c0_i32_0 : i32, i32
  }
  func.func @transform_13(%arg0: i32) -> (i32, i32) {
    %c0_i32 = arith.constant 0 : i32
    %c0_i32_0 = arith.constant 0 : i32
    return %arg0, %c0_i32 : i32, i32
  }
}

</mosaic_0001>

<bundles_post_ra>
// kernel: dam_debug_forward.2
= control target key start
LH: loop header
LB: loop body
LE: loop exit
PB: predicated region body
PF: predicated region fallthrough
CT: control target
= control target key end

     0   :  { %s2802_s1 = inlined_call_operand.vmem [shape: bf16[128,128], index: 1, kind: input, shape index: {}]   ;;  %s2803_s0 = inlined_call_operand.vmem [shape: bf16[4,288,128], index: 0, kind: input, shape index: {}]   ;;  %s2804_s2 = inlined_call_operand.vmem [shape: f32[1,128], index: 2, kind: input, shape index: {}]   ;;  %s2805_s3 = inlined_call_operand.vmem [shape: bf16[288,128], index: 3, kind: output, shape index: {}]  }
   0x1   :  { %v2151_v0 = vld [vmem:[%s2802_s1] sm:$0xff]   ;;  %v2152_v1 = vld [vmem:[%s2802_s1 + $0x8] sm:$0xff]   ;;  %v2153_v2 = vld [vmem:[%s2802_s1 + $0x10] sm:$0xff]  }
   0x2   :  { %1975 = vmatprep.subr.bf16.mxu0 %v2151_v0  ;;  %2135 = vmatprep.subr.bf16.mxu1 %v2151_v0  ;;  %v2154_v3 = vld [vmem:[%s2802_s1 + $0x18] sm:$0xff]   ;;  %v2159_v4 = vld [vmem:[%s2803_s0] sm:$0xff]   ;;  %v2156_v7 = vld [vmem:[%s2802_s1 + $0x28] sm:$0xff]  }
   0x3   :  { %1976 = vmatpush3.bf16.msra.mxu0 %v2151_v0  ;;  %2143 = vmatpush3.bf16.msra.mxu1 %v2151_v0  ;;  %v2161_v5 = vld [vmem:[%s2803_s0 + $0x120] sm:$0xff]   ;;  %v2157_v8 = vld [vmem:[%s2802_s1 + $0x30] sm:$0xff]   ;;  %v2158_v9 = vld [vmem:[%s2802_s1 + $0x38] sm:$0xff]  }
   0x4   :  { %1977 = vmatprep.subr.bf16.mxu0 %v2152_v1  ;;  %2136 = vmatprep.subr.bf16.mxu1 %v2152_v1  ;;  %v2155_v6 = vld [vmem:[%s2802_s1 + $0x20] sm:$0xff]   ;;  %v2160_v10 = vld [vmem:[%s2803_s0 + $0x8] sm:$0xff]   ;;  %v2163_v12 = vld [vmem:[%s2803_s0 + $0x10] sm:$0xff]  }
   0x5   :  { %1991 = vmatprep.mubr.bf16.mxu0 %v2159_v4  ;;  %2063 = vmatprep.mubr.bf16.mxu1 %v2161_v5  ;;  %v2162_v11 = vld [vmem:[%s2803_s0 + $0x128] sm:$0xff]   ;;  %v2165_v13 = vld [vmem:[%s2803_s0 + $0x130] sm:$0xff]   ;;  %v2164_v14 = vld [vmem:[%s2803_s0 + $0x18] sm:$0xff]  }
   0x6   :  { %v2166_v15 = vld [vmem:[%s2803_s0 + $0x138] sm:$0xff]   ;;  %v2167_v16 = vld [vmem:[%s2803_s0 + $0x20] sm:$0xff]   ;;  %v2168_v18 = vld [vmem:[%s2803_s0 + $0x28] sm:$0xff]  }
   0x7   :  { %1978 = vmatpush3.bf16.msra.mxu0 %v2152_v1  ;;  %2144 = vmatpush3.bf16.msra.mxu1 %v2152_v1  ;;  %v2169_v17 = vld [vmem:[%s2803_s0 + $0x140] sm:$0xff]   ;;  %v2170_v19 = vld [vmem:[%s2803_s0 + $0x148] sm:$0xff]   ;;  %v2171_v20 = vld [vmem:[%s2803_s0 + $0x30] sm:$0xff]  }
   0x8   :  { %1979 = vmatprep.subr.bf16.mxu0 %v2153_v2  ;;  %2137 = vmatprep.subr.bf16.mxu1 %v2153_v2  ;;  %v2173_v21 = vld [vmem:[%s2803_s0 + $0x150] sm:$0xff]   ;;  %v2172_v22 = vld [vmem:[%s2803_s0 + $0x38] sm:$0xff]   ;;  %v2175_v24 = vld [vmem:[%s2803_s0 + $0x40] sm:$0xff]  }
   0x9   :  { %v2174_v23 = vld [vmem:[%s2803_s0 + $0x158] sm:$0xff]   ;;  %v2177_v25 = vld [vmem:[%s2803_s0 + $0x160] sm:$0xff]   ;;  %v2176_v26 = vld [vmem:[%s2803_s0 + $0x48] sm:$0xff]  }
   0xa   :  { %v2178_v27 = vld [vmem:[%s2803_s0 + $0x168] sm:$0xff]   ;;  %v2179_v28 = vld [vmem:[%s2803_s0 + $0x50] sm:$0xff]   ;;  %v2180_v30 = vld [vmem:[%s2803_s0 + $0x58] sm:$0xff]  }
   0xb   :  { %1980 = vmatpush3.bf16.msra.mxu0 %v2153_v2  ;;  %2145 = vmatpush3.bf16.msra.mxu1 %v2153_v2  ;;  %v2181_v29 = vld [vmem:[%s2803_s0 + $0x170] sm:$0xff]   ;;  %v2182_v31 = vld [vmem:[%s2803_s0 + $0x178] sm:$0xff]   ;;  %v2183_v32 = vld [vmem:[%s2803_s0 + $0x60] sm:$0xff]  }
   0xc   :  { %1981 = vmatprep.subr.bf16.mxu0 %v2154_v3  ;;  %2138 = vmatprep.subr.bf16.mxu1 %v2154_v3  ;;  %v2185_v33 = vld [vmem:[%s2803_s0 + $0x180] sm:$0xff]   ;;  %v2184_v34 = vld [vmem:[%s2803_s0 + $0x68] sm:$0xff]   ;;  %v2187_v36 = vld [vmem:[%s2803_s0 + $0x70] sm:$0xff]  }
   0xd   :  { %v2186_v35 = vld [vmem:[%s2803_s0 + $0x188] sm:$0xff]   ;;  %v2189_v37 = vld [vmem:[%s2803_s0 + $0x190] sm:$0xff]   ;;  %v2188_v38 = vld [vmem:[%s2803_s0 + $0x78] sm:$0xff]  }
   0xe   :  { %v2190_v39 = vld [vmem:[%s2803_s0 + $0x198] sm:$0xff]   ;;  %v2191_v40 = vld [vmem:[%s2803_s0 + $0x80] sm:$0xff]   ;;  %v2192_v42 = vld [vmem:[%s2803_s0 + $0x88] sm:$0xff]  }
   0xf   :  { %1982 = vmatpush3.bf16.msra.mxu0 %v2154_v3  ;;  %2146 = vmatpush3.bf16.msra.mxu1 %v2154_v3  ;;  %v2193_v41 = vld [vmem:[%s2803_s0 + $0x1a0] sm:$0xff]   ;;  %v2194_v43 = vld [vmem:[%s2803_s0 + $0x1a8] sm:$0xff]   ;;  %v2195_v44 = vld [vmem:[%s2803_s0 + $0x90] sm:$0xff]  }
  0x10   :  { %1983 = vmatprep.subr.bf16.mxu0 %v2155_v6  ;;  %2139 = vmatprep.subr.bf16.mxu1 %v2155_v6  ;;  %v2197_v45 = vld [vmem:[%s2803_s0 + $0x1b0] sm:$0xff]   ;;  %v2196_v46 = vld [vmem:[%s2803_s0 + $0x98] sm:$0xff]   ;;  %v2199_v48 = vld [vmem:[%s2803_s0 + $0xa0] sm:$0xff]  }
  0x11   :  { %v2198_v47 = vld [vmem:[%s2803_s0 + $0x1b8] sm:$0xff]   ;;  %v2201_v49 = vld [vmem:[%s2803_s0 + $0x1c0] sm:$0xff]   ;;  %v2200_v50 = vld [vmem:[%s2803_s0 + $0xa8] sm:$0xff]  }
  0x12   :  { %v2202_v51 = vld [vmem:[%s2803_s0 + $0x1c8] sm:$0xff]   ;;  %v2203_v52 = vld [vmem:[%s2803_s0 + $0xb0] sm:$0xff]   ;;  %v2204_v54 = vld [vmem:[%s2803_s0 + $0xb8] sm:$0xff]  }
  0x13   :  { %1984 = vmatpush3.bf16.msra.mxu0 %v2155_v6  ;;  %2147 = vmatpush3.bf16.msra.mxu1 %v2155_v6  ;;  %v2205_v53 = vld [vmem:[%s2803_s0 + $0x1d0] sm:$0xff]   ;;  %v2206_v55 = vld [vmem:[%s2803_s0 + $0x1d8] sm:$0xff]   ;;  %v2207_v56 = vld [vmem:[%s2803_s0 + $0xc0] sm:$0xff]  }
  0x14   :  { %1985 = vmatprep.subr.bf16.mxu0 %v2156_v7  ;;  %2140 = vmatprep.subr.bf16.mxu1 %v2156_v7  ;;  %v2209_v57 = vld [vmem:[%s2803_s0 + $0x1e0] sm:$0xff]   ;;  %v2208_v58 = vld [vmem:[%s2803_s0 + $0xc8] sm:$0xff]   ;;  %v2211_v60 = vld [vmem:[%s2803_s0 + $0xd0] sm:$0xff]  }
  0x15   :  { %v2210_v59 = vld [vmem:[%s2803_s0 + $0x1e8] sm:$0xff]   ;;  %v2213_v61 = vld [vmem:[%s2803_s0 + $0x1f0] sm:$0xff]   ;;  %v2212_v62 = vld [vmem:[%s2803_s0 + $0xd8] sm:$0xff]  }
  0x16   :  { %v2214_v63 = vld [vmem:[%s2803_s0 + $0x1f8] sm:$0xff]   ;;  %v2215_v0 = vld [vmem:[%s2803_s0 + $0xe0] sm:$0xff]   ;;  %v2216_v2 = vld [vmem:[%s2803_s0 + $0xe8] sm:$0xff]  }
  0x17   :  { %1986 = vmatpush3.bf16.msra.mxu0 %v2156_v7  ;;  %2148 = vmatpush3.bf16.msra.mxu1 %v2156_v7  ;;  %v2217_v1 = vld [vmem:[%s2803_s0 + $0x200] sm:$0xff]   ;;  %v2218_v3 = vld [vmem:[%s2803_s0 + $0x208] sm:$0xff]   ;;  %v2219_v4 = vld [vmem:[%s2803_s0 + $0xf0] sm:$0xff]  }
  0x18   :  { %1987 = vmatprep.subr.bf16.mxu0 %v2157_v8  ;;  %2141 = vmatprep.subr.bf16.mxu1 %v2157_v8  ;;  %v2221_v5 = vld [vmem:[%s2803_s0 + $0x210] sm:$0xff]   ;;  %v2220_v6 = vld [vmem:[%s2803_s0 + $0xf8] sm:$0xff]  }
  0x19   :  { %v2222_v7 = vld [vmem:[%s2803_s0 + $0x218] sm:$0xff]  }
  0x1b   :  { %1988 = vmatpush3.bf16.msra.mxu0 %v2157_v8  ;;  %2149 = vmatpush3.bf16.msra.mxu1 %v2157_v8  ;;  %v2223_v8 = vld [vmem:[%s2803_s0 + $0x100] sm:$0xff]  }
  0x1c   :  { %1989 = vmatprep.subr.bf16.mxu0 %v2158_v9  ;;  %2142 = vmatprep.subr.bf16.mxu1 %v2158_v9 }
  0x1f   :  { %1990 = vmatpush3.bf16.msra.mxu0 %v2158_v9  ;;  %2150 = vmatpush3.bf16.msra.mxu1 %v2158_v9  ;;  %v2225_v9 = vld [vmem:[%s2803_s0 + $0x220] sm:$0xff]  }
  0x22   :  { %1992 = vmatmul.mubr.bf16.vlgmr.msra.gmra.mrb[0].mxu0 %v2160_v10  ;;  %2064 = vmatmul.mubr.bf16.vlgmr.msra.gmra.mrb[0].mxu1 %v2162_v11  ;;  %v2224_v10 = vld [vmem:[%s2803_s0 + $0x108] sm:$0xff]  }
  0x23   :  { %1995 = vmatprep.mubr.bf16.mxu0 %v2163_v12  ;;  %2067 = vmatprep.mubr.bf16.mxu1 %v2165_v13  ;;  %v2226_v11 = vld [vmem:[%s2803_s0 + $0x228] sm:$0xff]   ;;  %v2227_v12 = vld [vmem:[%s2803_s0 + $0x110] sm:$0xff]  }
  0x24   :  { %v2229_v13 = vld [vmem:[%s2803_s0 + $0x230] sm:$0xff]  }
  0x2a   :  { %1996 = vmatmul.mubr.bf16.gmra.mrb[4].mxu0 %v2164_v14  ;;  %2068 = vmatmul.mubr.bf16.gmra.mrb[4].mxu1 %v2166_v15  ;;  %v2228_v14 = vld [vmem:[%s2803_s0 + $0x118] sm:$0xff]  }
  0x2b   :  { %1999 = vmatprep.mubr.bf16.mxu0 %v2167_v16  ;;  %2071 = vmatprep.mubr.bf16.mxu1 %v2169_v17  ;;  %v2230_v15 = vld [vmem:[%s2803_s0 + $0x238] sm:$0xff]  }
  0x32   :  { %2000 = vmatmul.mubr.bf16.gmra.mrb[8].mxu0 %v2168_v18  ;;  %2072 = vmatmul.mubr.bf16.gmra.mrb[8].mxu1 %v2170_v19 }
  0x33   :  { %2003 = vmatprep.mubr.bf16.mxu0 %v2171_v20  ;;  %2075 = vmatprep.mubr.bf16.mxu1 %v2173_v21 }
  0x3a   :  { %2004 = vmatmul.mubr.bf16.gmra.mrb[12].mxu0 %v2172_v22  ;;  %2076 = vmatmul.mubr.bf16.gmra.mrb[12].mxu1 %v2174_v23 }
  0x3b   :  { %2007 = vmatprep.mubr.bf16.mxu0 %v2175_v24  ;;  %2079 = vmatprep.mubr.bf16.mxu1 %v2177_v25 }
  0x42   :  { %2008 = vmatmul.mubr.bf16.gmra.mrb[16].mxu0 %v2176_v26  ;;  %2080 = vmatmul.mubr.bf16.gmra.mrb[16].mxu1 %v2178_v27 }
  0x43   :  { %2011 = vmatprep.mubr.bf16.mxu0 %v2179_v28  ;;  %2083 = vmatprep.mubr.bf16.mxu1 %v2181_v29 }
  0x4a   :  { %2012 = vmatmul.mubr.bf16.gmra.mrb[20].mxu0 %v2180_v30  ;;  %2084 = vmatmul.mubr.bf16.gmra.mrb[20].mxu1 %v2182_v31 }
  0x4b   :  { %2015 = vmatprep.mubr.bf16.mxu0 %v2183_v32  ;;  %2087 = vmatprep.mubr.bf16.mxu1 %v2185_v33 }
  0x52   :  { %2016 = vmatmul.mubr.bf16.gmra.mrb[24].mxu0 %v2184_v34  ;;  %2088 = vmatmul.mubr.bf16.gmra.mrb[24].mxu1 %v2186_v35 }
  0x53   :  { %2019 = vmatprep.mubr.bf16.mxu0 %v2187_v36  ;;  %2091 = vmatprep.mubr.bf16.mxu1 %v2189_v37 }
  0x5a   :  { %2020 = vmatmul.mubr.bf16.gmra.mrb[28].mxu0 %v2188_v38  ;;  %2092 = vmatmul.mubr.bf16.gmra.mrb[28].mxu1 %v2190_v39 }
  0x5b   :  { %2023 = vmatprep.mubr.bf16.mxu0 %v2191_v40  ;;  %2095 = vmatprep.mubr.bf16.mxu1 %v2193_v41 }
  0x62   :  { %2024 = vmatmul.mubr.bf16.gmra.mrb[32].mxu0 %v2192_v42  ;;  %2096 = vmatmul.mubr.bf16.gmra.mrb[32].mxu1 %v2194_v43 }
  0x63   :  { %2027 = vmatprep.mubr.bf16.mxu0 %v2195_v44  ;;  %2099 = vmatprep.mubr.bf16.mxu1 %v2197_v45 }
  0x6a   :  { %2028 = vmatmul.mubr.bf16.gmra.mrb[36].mxu0 %v2196_v46  ;;  %2100 = vmatmul.mubr.bf16.gmra.mrb[36].mxu1 %v2198_v47 }
  0x6b   :  { %2031 = vmatprep.mubr.bf16.mxu0 %v2199_v48  ;;  %2103 = vmatprep.mubr.bf16.mxu1 %v2201_v49 }
  0x72   :  { %2032 = vmatmul.mubr.bf16.gmra.mrb[40].mxu0 %v2200_v50  ;;  %2104 = vmatmul.mubr.bf16.gmra.mrb[40].mxu1 %v2202_v51 }
  0x73   :  { %2035 = vmatprep.mubr.bf16.mxu0 %v2203_v52  ;;  %2107 = vmatprep.mubr.bf16.mxu1 %v2205_v53 }
  0x7a   :  { %2036 = vmatmul.mubr.bf16.gmra.mrb[44].mxu0 %v2204_v54  ;;  %2108 = vmatmul.mubr.bf16.gmra.mrb[44].mxu1 %v2206_v55 }
  0x7b   :  { %2039 = vmatprep.mubr.bf16.mxu0 %v2207_v56  ;;  %2111 = vmatprep.mubr.bf16.mxu1 %v2209_v57 }
  0x82   :  { %2040 = vmatmul.mubr.bf16.gmra.mrb[48].mxu0 %v2208_v58  ;;  %2112 = vmatmul.mubr.bf16.gmra.mrb[48].mxu1 %v2210_v59 }
  0x83   :  { %2043 = vmatprep.mubr.bf16.mxu0 %v2211_v60  ;;  %2115 = vmatprep.mubr.bf16.mxu1 %v2213_v61 }
  0x8a   :  { %2044 = vmatmul.mubr.bf16.gmra.mrb[52].mxu0 %v2212_v62  ;;  %2116 = vmatmul.mubr.bf16.gmra.mrb[52].mxu1 %v2214_v63 }
  0x8b   :  { %2047 = vmatprep.mubr.bf16.mxu0 %v2215_v0  ;;  %2119 = vmatprep.mubr.bf16.mxu1 %v2217_v1 }
  0x92   :  { %2048 = vmatmul.mubr.bf16.gmra.mrb[56].mxu0 %v2216_v2  ;;  %2120 = vmatmul.mubr.bf16.gmra.mrb[56].mxu1 %v2218_v3 }
  0x93   :  { %2051 = vmatprep.mubr.bf16.mxu0 %v2219_v4  ;;  %2123 = vmatprep.mubr.bf16.mxu1 %v2221_v5 }
  0x9a   :  { %2052 = vmatmul.mubr.bf16.gmra.mrb[60].mxu0 %v2220_v6  ;;  %2124 = vmatmul.mubr.bf16.gmra.mrb[60].mxu1 %v2222_v7 }
  0x9b   :  { %2055 = vmatprep.mubr.bf16.mxu0 %v2223_v8  ;;  %2127 = vmatprep.mubr.bf16.mxu1 %v2225_v9 }
  0xa2   :  { %2056 = vmatmul.mubr.bf16.gmra.mrb[64].mxu0 %v2224_v10  ;;  %2128 = vmatmul.mubr.bf16.gmra.mrb[64].mxu1 %v2226_v11 }
  0xa3   :  { %2059 = vmatprep.mubr.bf16.mxu0 %v2227_v12  ;;  %2131 = vmatprep.mubr.bf16.mxu1 %v2229_v13 }
  0xaa   :  { %2060 = vmatmul.mubr.bf16.gmra.mrb[68].mxu0 %v2228_v14  ;;  %2132 = vmatmul.mubr.bf16.gmra.mrb[68].mxu1 %v2230_v15 }
  0xf5   :  { %v2491_v16 = vpop.f32.mrb[0].mxu0  ;;  %v2493_v17 = vpop.f32.mrb[0].mxu1 }
  0xf6   :  { %v2495_v18 = vpop.f32.mrb[1].mxu0  ;;  %v2497_v19 = vpop.f32.mrb[1].mxu1 }
  0xf7   :  { %v2499_v20 = vpop.f32.mrb[2].mxu0  ;;  %v2501_v21 = vpop.f32.mrb[2].mxu1 }
  0xf8   :  { %v2503_v22 = vpop.f32.mrb[3].mxu0  ;;  %v2505_v23 = vpop.f32.mrb[3].mxu1 }
  0xfd   :  { %v2507_v24 = vpop.f32.mrb[4].mxu0  ;;  %v2509_v25 = vpop.f32.mrb[4].mxu1 }
  0xfe   :  { %v2511_v26 = vpop.f32.mrb[5].mxu0  ;;  %v2513_v27 = vpop.f32.mrb[5].mxu1 }
  0xff   :  { %v2515_v28 = vpop.f32.mrb[6].mxu0  ;;  %v2517_v29 = vpop.f32.mrb[6].mxu1 }
 0x100   :  { %v2519_v30 = vpop.f32.mrb[7].mxu0  ;;  %v2521_v31 = vpop.f32.mrb[7].mxu1 }
 0x105   :  { %v2523_v32 = vpop.f32.mrb[8].mxu0  ;;  %v2525_v33 = vpop.f32.mrb[8].mxu1 }
 0x106   :  { %v2527_v34 = vpop.f32.mrb[9].mxu0  ;;  %v2529_v35 = vpop.f32.mrb[9].mxu1 }
 0x107   :  { %v2531_v36 = vpop.f32.mrb[10].mxu0  ;;  %v2533_v37 = vpop.f32.mrb[10].mxu1 }
 0x108   :  { %v2535_v38 = vpop.f32.mrb[11].mxu0  ;;  %v2537_v39 = vpop.f32.mrb[11].mxu1 }
 0x10d   :  { %v2539_v40 = vpop.f32.mrb[12].mxu0  ;;  %v2541_v41 = vpop.f32.mrb[12].mxu1 }
 0x10e   :  { %v2543_v42 = vpop.f32.mrb[13].mxu0  ;;  %v2545_v43 = vpop.f32.mrb[13].mxu1 }
 0x10f   :  { %v2547_v44 = vpop.f32.mrb[14].mxu0  ;;  %v2549_v45 = vpop.f32.mrb[14].mxu1 }
 0x110   :  { %v2551_v46 = vpop.f32.mrb[15].mxu0  ;;  %v2553_v47 = vpop.f32.mrb[15].mxu1 }
 0x115   :  { %v2555_v48 = vpop.f32.mrb[16].mxu0  ;;  %v2557_v49 = vpop.f32.mrb[16].mxu1 }
 0x116   :  { %v2559_v50 = vpop.f32.mrb[17].mxu0  ;;  %v2561_v51 = vpop.f32.mrb[17].mxu1 }
 0x117   :  { %v2563_v52 = vpop.f32.mrb[18].mxu0  ;;  %v2565_v53 = vpop.f32.mrb[18].mxu1 }
 0x118   :  { %v2567_v54 = vpop.f32.mrb[19].mxu0  ;;  %v2569_v55 = vpop.f32.mrb[19].mxu1 }
 0x11d   :  { %v2571_v56 = vpop.f32.mrb[20].mxu0  ;;  %v2573_v57 = vpop.f32.mrb[20].mxu1 }
 0x11e   :  { %v2575_v58 = vpop.f32.mrb[21].mxu0  ;;  %v2577_v59 = vpop.f32.mrb[21].mxu1 }
 0x11f   :  { %v2579_v60 = vpop.f32.mrb[22].mxu0  ;;  %v2581_v61 = vpop.f32.mrb[22].mxu1 }
 0x120   :  { %2806 = vst [vmem:[#allocation2_spill] sm:$0xff] %v2581_v61  ;;  %v2583_v62 = vpop.f32.mrb[23].mxu0  ;;  %v2585_v63 = vpop.f32.mrb[23].mxu1 }
 0x121   :  { %2807 = vst [vmem:[#allocation3_spill] sm:$0xff] %v2585_v63 }
 0x125   :  { %v2587_v0 = vpop.f32.mrb[24].mxu0  ;;  %v2589_v1 = vpop.f32.mrb[24].mxu1 }
 0x126   :  { %2808 = vst [vmem:[#allocation4_spill] sm:$0xff] %v2587_v0  ;;  %2809 = vst [vmem:[#allocation5_spill] sm:$0xff] %v2589_v1  ;;  %v2591_v2 = vpop.f32.mrb[25].mxu0  ;;  %v2593_v3 = vpop.f32.mrb[25].mxu1 }
 0x127   :  { %2810 = vst [vmem:[#allocation6_spill] sm:$0xff] %v2591_v2  ;;  %2811 = vst [vmem:[#allocation7_spill] sm:$0xff] %v2593_v3  ;;  %v2595_v4 = vpop.f32.mrb[26].mxu0  ;;  %v2597_v5 = vpop.f32.mrb[26].mxu1 }
 0x128   :  { %2812 = vst [vmem:[#allocation8_spill] sm:$0xff] %v2595_v4  ;;  %2813 = vst [vmem:[#allocation9_spill] sm:$0xff] %v2597_v5  ;;  %v2599_v6 = vpop.f32.mrb[27].mxu0  ;;  %v2601_v7 = vpop.f32.mrb[27].mxu1 }
 0x129   :  { %2814 = vst [vmem:[#allocation10_spill] sm:$0xff] %v2599_v6  ;;  %2815 = vst [vmem:[#allocation11_spill] sm:$0xff] %v2601_v7 }
 0x12d   :  { %v2603_v8 = vpop.f32.mrb[28].mxu0  ;;  %v2605_v9 = vpop.f32.mrb[28].mxu1 }
 0x12e   :  { %2816 = vst [vmem:[#allocation12_spill] sm:$0xff] %v2603_v8  ;;  %2817 = vst [vmem:[#allocation13_spill] sm:$0xff] %v2605_v9  ;;  %v2607_v10 = vpop.f32.mrb[29].mxu0  ;;  %v2609_v11 = vpop.f32.mrb[29].mxu1 }
 0x12f   :  { %2818 = vst [vmem:[#allocation14_spill] sm:$0xff] %v2607_v10  ;;  %2819 = vst [vmem:[#allocation15_spill] sm:$0xff] %v2609_v11  ;;  %v2611_v12 = vpop.f32.mrb[30].mxu0  ;;  %v2613_v13 = vpop.f32.mrb[30].mxu1 }
 0x130   :  { %2820 = vst [vmem:[#allocation16_spill] sm:$0xff] %v2611_v12  ;;  %2821 = vst [vmem:[#allocation17_spill] sm:$0xff] %v2613_v13  ;;  %v2615_v14 = vpop.f32.mrb[31].mxu0  ;;  %v2617_v15 = vpop.f32.mrb[31].mxu1 }
 0x131   :  { %2822 = vst [vmem:[#allocation18_spill] sm:$0xff] %v2615_v14  ;;  %2823 = vst [vmem:[#allocation19_spill] sm:$0xff] %v2617_v15 }
 0x135   :  { %v2619_v5 = vpop.f32.mrb[32].mxu0  ;;  %v2621_v6 = vpop.f32.mrb[32].mxu1 }
 0x136   :  { %2824 = vst [vmem:[#allocation20_spill] sm:$0xff] %v2619_v5  ;;  %2825 = vst [vmem:[#allocation21_spill] sm:$0xff] %v2621_v6  ;;  %v2623_v7 = vpop.f32.mrb[33].mxu0  ;;  %v2625_v8 = vpop.f32.mrb[33].mxu1 }
 0x137   :  { %2826 = vst [vmem:[#allocation22_spill] sm:$0xff] %v2623_v7  ;;  %2827 = vst [vmem:[#allocation23_spill] sm:$0xff] %v2625_v8  ;;  %v2627_v9 = vpop.f32.mrb[34].mxu0  ;;  %v2629_v10 = vpop.f32.mrb[34].mxu1 }
 0x138   :  { %2828 = vst [vmem:[#allocation24_spill] sm:$0xff] %v2627_v9  ;;  %2829 = vst [vmem:[#allocation25_spill] sm:$0xff] %v2629_v10  ;;  %v2631_v11 = vpop.f32.mrb[35].mxu0  ;;  %v2633_v12 = vpop.f32.mrb[35].mxu1 }
 0x139   :  { %2830 = vst [vmem:[#allocation26_spill] sm:$0xff] %v2631_v11  ;;  %2831 = vst [vmem:[#allocation27_spill] sm:$0xff] %v2633_v12  ;;  %v2642_v12 = vld [vmem:[%s2804_s2] ss:$0 sm:$0xff] }
 0x13d   :  { %v2029_v13 = vpop.f32.mrb[36].mxu0  ;;  %v2101_v14 = vpop.f32.mrb[36].mxu1 }
 0x13e   :  { %v1270_v15 = vmax.f32 %v2491_v16, %v2029_v13  ;;  %v833_v3 = vpop.f32.mrb[37].mxu0  ;;  %v1121_v5 = vpop.f32.mrb[37].mxu1 }
 0x13f   :  { %v1264_v6 = vmax.f32 %v2495_v18, %v833_v3  ;;  %v2030_v4 = vpop.f32.mrb[38].mxu0  ;;  %v2102_v7 = vpop.f32.mrb[38].mxu1 }
 0x140   :  { %v1271_v8 = vmax.f32 %v1270_v15, %v2493_v17  ;;  %v1273_v9 = vmax.f32 %v2499_v20, %v2030_v4  ;;  %v836_v1 = vpop.f32.mrb[39].mxu0  ;;  %v1124_v10 = vpop.f32.mrb[39].mxu1 }
 0x141   :  { %v1265_v11 = vmax.f32 %v1264_v6, %v2497_v19  ;;  %v1267_v16 = vmax.f32 %v2503_v22, %v836_v1 }
 0x142   :  { %v1272_v13 = vmax.f32 %v1271_v8, %v2101_v14  ;;  %v1274_v18 = vmax.f32 %v1273_v9, %v2501_v21 }
 0x143   :  { %v1266_v3 = vmax.f32 %v1265_v11, %v1121_v5  ;;  %v1268_v2 = vmax.f32 %v1267_v16, %v2505_v23 }
 0x144   :  { %v1381_v17 = vadd.f32 %v2642_v12, %v1272_v13  ;;  %v1275_v20 = vmax.f32 %v1274_v18, %v2102_v7 }
 0x145   :  { %v1379_v4 = vadd.f32 %v2642_v12, %v1266_v3  ;;  %v1269_v15 = vmax.f32 %v1268_v2, %v1124_v10  ;;  %v2033_v0 = vpop.f32.mrb[40].mxu0  ;;  %v2105_v63 = vpop.f32.mrb[40].mxu1 }
 0x146   :  { %v1382_v61 = vadd.f32 %v2642_v12, %v1275_v20  ;;  %v1282_v19 = vmax.f32 %v2507_v24, %v2033_v0  ;;  %v849_v6 = vpop.f32.mrb[41].mxu0  ;;  %v1137_v22 = vpop.f32.mrb[41].mxu1  ;;  %v1417_v8 = vmax.f32 %v1381_v17, 0.0 }
 0x147   :  { %v1380_v1 = vadd.f32 %v2642_v12, %v1269_v15  ;;  %v1276_v21 = vmax.f32 %v2511_v26, %v849_v6  ;;  %v2034_v5 = vpop.f32.mrb[42].mxu0  ;;  %v2106_v23 = vpop.f32.mrb[42].mxu1  ;;  %v1415_v14 = vmax.f32 %v1379_v4, 0.0 }
 0x148   :  { %v1418_v9 = vmax.f32 %v1382_v61, 0.0  ;;  %v1283_v7 = vmax.f32 %v1282_v19, %v2509_v25  ;;  %v1285_v2 = vmax.f32 %v2515_v28, %v2034_v5  ;;  %v852_v10 = vpop.f32.mrb[43].mxu0  ;;  %v1140_v11 = vpop.f32.mrb[43].mxu1 }
 0x149   :  { %v1416_v16 = vmax.f32 %v1380_v1, 0.0  ;;  %v1277_v24 = vmax.f32 %v1276_v21, %v2513_v27  ;;  %v1279_v0 = vmax.f32 %v2519_v30, %v852_v10 }
 0x14a   :  { %v1796_v13 = vpack.c.bf16 %v1418_v9, %v1417_v8  ;;  %v1284_v18 = vmax.f32 %v1283_v7, %v2105_v63  ;;  %v1286_v26 = vmax.f32 %v1285_v2, %v2517_v29 }
 0x14b   :  { %v1791_v3 = vpack.c.bf16 %v1416_v16, %v1415_v14  ;;  %v1278_v20 = vmax.f32 %v1277_v24, %v1137_v22  ;;  %v1280_v61 = vmax.f32 %v1279_v0, %v2521_v31 }
 0x14c   :  { %1878 = vst [vmem:[%s2805_s3 + $0x8] sm:$0xff] %v1796_v13   ;;  %v1385_v25 = vadd.f32 %v2642_v12, %v1284_v18  ;;  %v1287_v28 = vmax.f32 %v1286_v26, %v2106_v23 }
 0x14d   :  { %1792 = vst [vmem:[%s2805_s3] sm:$0xff] %v1791_v3   ;;  %v1383_v27 = vadd.f32 %v2642_v12, %v1278_v20  ;;  %v1281_v30 = vmax.f32 %v1280_v61, %v1140_v11  ;;  %v2037_v63 = vpop.f32.mrb[44].mxu0  ;;  %v2109_v29 = vpop.f32.mrb[44].mxu1 }
 0x14e   :  { %v1386_v17 = vadd.f32 %v2642_v12, %v1287_v28  ;;  %v1294_v31 = vmax.f32 %v2523_v32, %v2037_v63  ;;  %v865_v4 = vpop.f32.mrb[45].mxu0  ;;  %v1153_v15 = vpop.f32.mrb[45].mxu1  ;;  %v1421_v21 = vmax.f32 %v1385_v25, 0.0 }
 0x14f   :  { %v1384_v19 = vadd.f32 %v2642_v12, %v1281_v30  ;;  %v1288_v6 = vmax.f32 %v2527_v34, %v865_v4  ;;  %v2038_v22 = vpop.f32.mrb[46].mxu0  ;;  %v2110_v1 = vpop.f32.mrb[46].mxu1  ;;  %v1419_v2 = vmax.f32 %v1383_v27, 0.0 }
 0x150   :  { %v1422_v5 = vmax.f32 %v1386_v17, 0.0  ;;  %v1295_v23 = vmax.f32 %v1294_v31, %v2525_v33  ;;  %v1297_v8 = vmax.f32 %v2531_v36, %v2038_v22  ;;  %v868_v9 = vpop.f32.mrb[47].mxu0  ;;  %v1156_v7 = vpop.f32.mrb[47].mxu1 }
 0x151   :  { %v1420_v10 = vmax.f32 %v1384_v19, 0.0  ;;  %v1289_v32 = vmax.f32 %v1288_v6, %v2529_v35  ;;  %v1291_v11 = vmax.f32 %v2535_v38, %v868_v9 }
 0x152   :  { %v1806_v14 = vpack.c.bf16 %v1422_v5, %v1421_v21  ;;  %v1296_v16 = vmax.f32 %v1295_v23, %v2109_v29  ;;  %v1298_v34 = vmax.f32 %v1297_v8, %v2533_v37 }
 0x153   :  { %v1801_v24 = vpack.c.bf16 %v1420_v10, %v1419_v2  ;;  %v1290_v0 = vmax.f32 %v1289_v32, %v1153_v15  ;;  %v1292_v13 = vmax.f32 %v1291_v11, %v2537_v39 }
 0x154   :  { %1880 = vst [vmem:[%s2805_s3 + $0x18] sm:$0xff] %v1806_v14   ;;  %v1389_v33 = vadd.f32 %v2642_v12, %v1296_v16  ;;  %v1299_v36 = vmax.f32 %v1298_v34, %v2110_v1 }
 0x155   :  { %1879 = vst [vmem:[%s2805_s3 + $0x10] sm:$0xff] %v1801_v24   ;;  %v1387_v35 = vadd.f32 %v2642_v12, %v1290_v0  ;;  %v1293_v38 = vmax.f32 %v1292_v13, %v1156_v7  ;;  %v2041_v18 = vpop.f32.mrb[48].mxu0  ;;  %v2113_v37 = vpop.f32.mrb[48].mxu1 }
 0x156   :  { %v1390_v26 = vadd.f32 %v2642_v12, %v1299_v36  ;;  %v1306_v39 = vmax.f32 %v2539_v40, %v2041_v18  ;;  %v881_v3 = vpop.f32.mrb[49].mxu0  ;;  %v1169_v20 = vpop.f32.mrb[49].mxu1  ;;  %v1425_v30 = vmax.f32 %v1389_v33, 0.0 }
 0x157   :  { %v1388_v61 = vadd.f32 %v2642_v12, %v1293_v38  ;;  %v1300_v25 = vmax.f32 %v2543_v42, %v881_v3  ;;  %v2042_v28 = vpop.f32.mrb[50].mxu0  ;;  %v2114_v27 = vpop.f32.mrb[50].mxu1  ;;  %v1423_v15 = vmax.f32 %v1387_v35, 0.0 }
 0x158   :  { %v1426_v63 = vmax.f32 %v1390_v26, 0.0  ;;  %v1307_v29 = vmax.f32 %v1306_v39, %v2541_v41  ;;  %v1309_v17 = vmax.f32 %v2547_v44, %v2042_v28  ;;  %v884_v31 = vpop.f32.mrb[51].mxu0  ;;  %v1172_v4 = vpop.f32.mrb[51].mxu1 }
 0x159   :  { %v1424_v19 = vmax.f32 %v1388_v61, 0.0  ;;  %v1301_v40 = vmax.f32 %v1300_v25, %v2545_v43  ;;  %v1303_v6 = vmax.f32 %v2551_v46, %v884_v31 }
 0x15a   :  { %v1816_v22 = vpack.c.bf16 %v1426_v63, %v1425_v30  ;;  %v1308_v1 = vmax.f32 %v1307_v29, %v2113_v37  ;;  %v1310_v42 = vmax.f32 %v1309_v17, %v2549_v45 }
 0x15b   :  { %v1811_v21 = vpack.c.bf16 %v1424_v19, %v1423_v15  ;;  %v1302_v5 = vmax.f32 %v1301_v40, %v1169_v20  ;;  %v1304_v23 = vmax.f32 %v1303_v6, %v2553_v47 }
 0x15c   :  { %1882 = vst [vmem:[%s2805_s3 + $0x28] sm:$0xff] %v1816_v22   ;;  %v1393_v41 = vadd.f32 %v2642_v12, %v1308_v1  ;;  %v1311_v44 = vmax.f32 %v1310_v42, %v2114_v27 }
 0x15d   :  { %1881 = vst [vmem:[%s2805_s3 + $0x20] sm:$0xff] %v1811_v21   ;;  %v1391_v43 = vadd.f32 %v2642_v12, %v1302_v5  ;;  %v1305_v46 = vmax.f32 %v1304_v23, %v1172_v4  ;;  %v2045_v8 = vpop.f32.mrb[52].mxu0  ;;  %v2117_v45 = vpop.f32.mrb[52].mxu1  ;;  %v2832_v5 = vld [vmem:[#allocation2_spill] sm:$0xff] }
 0x15e   :  { %v1394_v9 = vadd.f32 %v2642_v12, %v1311_v44  ;;  %v1318_v47 = vmax.f32 %v2555_v48, %v2045_v8  ;;  %v897_v7 = vpop.f32.mrb[53].mxu0  ;;  %v1185_v2 = vpop.f32.mrb[53].mxu1  ;;  %v1429_v16 = vmax.f32 %v1393_v41, 0.0  ;;  %v2833_v44 = vld [vmem:[#allocation3_spill] sm:$0xff] }
 0x15f   :  { %v1392_v10 = vadd.f32 %v2642_v12, %v1305_v46  ;;  %v1312_v32 = vmax.f32 %v2559_v50, %v897_v7  ;;  %v2046_v11 = vpop.f32.mrb[54].mxu0  ;;  %v2118_v14 = vpop.f32.mrb[54].mxu1  ;;  %v1427_v36 = vmax.f32 %v1391_v43, 0.0 }
 0x160   :  { %v1430_v34 = vmax.f32 %v1394_v9, 0.0  ;;  %v1319_v24 = vmax.f32 %v1318_v47, %v2557_v49  ;;  %v1321_v0 = vmax.f32 %v2563_v52, %v2046_v11  ;;  %v900_v13 = vpop.f32.mrb[55].mxu0  ;;  %v1188_v33 = vpop.f32.mrb[55].mxu1  ;;  %v2834_v9 = vld [vmem:[#allocation4_spill] sm:$0xff] }
 0x161   :  { %v1428_v35 = vmax.f32 %v1392_v10, 0.0  ;;  %v1313_v48 = vmax.f32 %v1312_v32, %v2561_v51  ;;  %v1315_v38 = vmax.f32 %v2567_v54, %v900_v13  ;;  %v2835_v32 = vld [vmem:[#allocation6_spill] sm:$0xff] }
 0x162   :  { %v1826_v18 = vpack.c.bf16 %v1430_v34, %v1429_v16  ;;  %v1320_v37 = vmax.f32 %v1319_v24, %v2117_v45  ;;  %v1322_v50 = vmax.f32 %v1321_v0, %v2565_v53  ;;  %v2836_v0 = vld [vmem:[#allocation5_spill] sm:$0xff] }
 0x163   :  { %v1821_v26 = vpack.c.bf16 %v1428_v35, %v1427_v36  ;;  %v1314_v39 = vmax.f32 %v1313_v48, %v1185_v2  ;;  %v1316_v3 = vmax.f32 %v1315_v38, %v2569_v55 }
 0x164   :  { %1884 = vst [vmem:[%s2805_s3 + $0x38] sm:$0xff] %v1826_v18   ;;  %v1397_v49 = vadd.f32 %v2642_v12, %v1320_v37  ;;  %v1323_v52 = vmax.f32 %v1322_v50, %v2118_v14  ;;  %v2838_v37 = vld [vmem:[#allocation7_spill] sm:$0xff] }
 0x165   :  { %1883 = vst [vmem:[%s2805_s3 + $0x30] sm:$0xff] %v1821_v26   ;;  %v1395_v51 = vadd.f32 %v2642_v12, %v1314_v39  ;;  %v1317_v54 = vmax.f32 %v1316_v3, %v1188_v33  ;;  %v2049_v20 = vpop.f32.mrb[56].mxu0  ;;  %v2121_v53 = vpop.f32.mrb[56].mxu1  ;;  %v2837_v33 = vld [vmem:[#allocation8_spill] sm:$0xff]  ;;  %v2839_v26 = vld [vmem:[#allocation10_spill] sm:$0xff] }
 0x166   :  { %v1398_v61 = vadd.f32 %v2642_v12, %v1323_v52  ;;  %v1330_v55 = vmax.f32 %v2571_v56, %v2049_v20  ;;  %v913_v25 = vpop.f32.mrb[57].mxu0  ;;  %v1201_v28 = vpop.f32.mrb[57].mxu1  ;;  %v1433_v17 = vmax.f32 %v1397_v49, 0.0  ;;  %v2840_v52 = vld [vmem:[#allocation9_spill] sm:$0xff] }
 0x167   :  { %v1396_v27 = vadd.f32 %v2642_v12, %v1317_v54  ;;  %v1324_v30 = vmax.f32 %v2575_v58, %v913_v25  ;;  %v2050_v63 = vpop.f32.mrb[58].mxu0  ;;  %v2122_v29 = vpop.f32.mrb[58].mxu1  ;;  %v1431_v6 = vmax.f32 %v1395_v51, 0.0 }
 0x168   :  { %v1434_v31 = vmax.f32 %v1398_v61, 0.0  ;;  %v1331_v4 = vmax.f32 %v1330_v55, %v2573_v57  ;;  %v1333_v15 = vmax.f32 %v2579_v60, %v2050_v63  ;;  %v916_v19 = vpop.f32.mrb[59].mxu0  ;;  %v1204_v40 = vpop.f32.mrb[59].mxu1 }
 0x169   :  { %v1432_v22 = vmax.f32 %v1396_v27, 0.0  ;;  %v1325_v56 = vmax.f32 %v1324_v30, %v2577_v59  ;;  %v1327_v1 = vmax.f32 %v2583_v62, %v916_v19 }
 0x16a   :  { %v1836_v42 = vpack.c.bf16 %v1434_v31, %v1433_v17  ;;  %v1332_v21 = vmax.f32 %v1331_v4, %v2121_v53  ;;  %v1334_v58 = vmax.f32 %v1333_v15, %v2832_v5  ;;  %v2841_v53 = vld [vmem:[#allocation11_spill] sm:$0xff]  ;;  %v2842_v17 = vld [vmem:[#allocation12_spill] sm:$0xff] }
 0x16b   :  { %v1831_v23 = vpack.c.bf16 %v1432_v22, %v1431_v6  ;;  %v1326_v41 = vmax.f32 %v1325_v56, %v1201_v28  ;;  %v1328_v43 = vmax.f32 %v1327_v1, %v2833_v44 }
 0x16c   :  { %1886 = vst [vmem:[%s2805_s3 + $0x48] sm:$0xff] %v1836_v42   ;;  %v1401_v57 = vadd.f32 %v2642_v12, %v1332_v21  ;;  %v1335_v60 = vmax.f32 %v1334_v58, %v2122_v29  ;;  %v2844_v21 = vld [vmem:[#allocation13_spill] sm:$0xff]  ;;  %v2845_v58 = vld [vmem:[#allocation16_spill] sm:$0xff] }
 0x16d   :  { %1885 = vst [vmem:[%s2805_s3 + $0x40] sm:$0xff] %v1831_v23   ;;  %v1399_v59 = vadd.f32 %v2642_v12, %v1326_v41  ;;  %v1329_v62 = vmax.f32 %v1328_v43, %v1204_v40  ;;  %v2053_v46 = vpop.f32.mrb[60].mxu0  ;;  %v2125_v8 = vpop.f32.mrb[60].mxu1  ;;  %v2843_v40 = vld [vmem:[#allocation14_spill] sm:$0xff] }
 0x16e   :  { %v1402_v45 = vadd.f32 %v2642_v12, %v1335_v60  ;;  %v1342_v47 = vmax.f32 %v2834_v9, %v2053_v46  ;;  %v929_v7 = vpop.f32.mrb[61].mxu0  ;;  %v1217_v2 = vpop.f32.mrb[61].mxu1  ;;  %v1437_v34 = vmax.f32 %v1401_v57, 0.0  ;;  %v2846_v60 = vld [vmem:[#allocation15_spill] sm:$0xff]  ;;  %v2848_v9 = vld [vmem:[#allocation17_spill] sm:$0xff] }
 0x16f   :  { %v1400_v10 = vadd.f32 %v2642_v12, %v1329_v62  ;;  %v1336_v11 = vmax.f32 %v2835_v32, %v929_v7  ;;  %v2054_v14 = vpop.f32.mrb[62].mxu0  ;;  %v2126_v16 = vpop.f32.mrb[62].mxu1  ;;  %v1435_v38 = vmax.f32 %v1399_v59, 0.0  ;;  %v2847_v62 = vld [vmem:[#allocation18_spill] sm:$0xff] }
 0x170   :  { %v1438_v24 = vmax.f32 %v1402_v45, 0.0  ;;  %v1343_v13 = vmax.f32 %v1342_v47, %v2836_v0  ;;  %v1345_v36 = vmax.f32 %v2837_v33, %v2054_v14  ;;  %v932_v35 = vpop.f32.mrb[63].mxu0  ;;  %v1220_v48 = vpop.f32.mrb[63].mxu1  ;;  %v2850_v33 = vld [vmem:[#allocation20_spill] sm:$0xff] }
 0x171   :  { %v1436_v18 = vmax.f32 %v1400_v10, 0.0  ;;  %v1337_v50 = vmax.f32 %v1336_v11, %v2838_v37  ;;  %v1339_v39 = vmax.f32 %v2839_v26, %v932_v35  ;;  %v2849_v10 = vld [vmem:[#allocation19_spill] sm:$0xff] }
 0x172   :  { %v1846_v3 = vpack.c.bf16 %v1438_v24, %v1437_v34  ;;  %v1344_v49 = vmax.f32 %v1343_v13, %v2125_v8  ;;  %v1346_v51 = vmax.f32 %v1345_v36, %v2840_v52 }
 0x173   :  { %v1841_v54 = vpack.c.bf16 %v1436_v18, %v1435_v38  ;;  %v1338_v20 = vmax.f32 %v1337_v50, %v1217_v2  ;;  %v1340_v61 = vmax.f32 %v1339_v39, %v2841_v53  ;;  %v2851_v18 = vld [vmem:[#allocation22_spill] sm:$0xff] }
 0x174   :  { %1888 = vst [vmem:[%s2805_s3 + $0x58] sm:$0xff] %v1846_v3   ;;  %v1405_v55 = vadd.f32 %v2642_v12, %v1344_v49  ;;  %v1347_v25 = vmax.f32 %v1346_v51, %v2126_v16  ;;  %v2852_v49 = vld [vmem:[#allocation21_spill] sm:$0xff]  ;;  %v2853_v51 = vld [vmem:[#allocation24_spill] sm:$0xff] }
 0x175   :  { %1887 = vst [vmem:[%s2805_s3 + $0x50] sm:$0xff] %v1841_v54   ;;  %v1403_v28 = vadd.f32 %v2642_v12, %v1338_v20  ;;  %v1341_v27 = vmax.f32 %v1340_v61, %v1220_v48  ;;  %v2057_v30 = vpop.f32.mrb[64].mxu0  ;;  %v2129_v63 = vpop.f32.mrb[64].mxu1 }
 0x176   :  { %v1406_v29 = vadd.f32 %v2642_v12, %v1347_v25  ;;  %v1354_v31 = vmax.f32 %v2842_v17, %v2057_v30  ;;  %v945_v4 = vpop.f32.mrb[65].mxu0  ;;  %v1233_v15 = vpop.f32.mrb[65].mxu1  ;;  %v1441_v1 = vmax.f32 %v1405_v55, 0.0  ;;  %v2854_v25 = vld [vmem:[#allocation23_spill] sm:$0xff]  ;;  %v2856_v17 = vld [vmem:[#allocation25_spill] sm:$0xff] }
 0x177   :  { %v1404_v19 = vadd.f32 %v2642_v12, %v1341_v27  ;;  %v1348_v6 = vmax.f32 %v2843_v40, %v945_v4  ;;  %v2058_v22 = vpop.f32.mrb[66].mxu0  ;;  %v2130_v56 = vpop.f32.mrb[66].mxu1  ;;  %v1439_v43 = vmax.f32 %v1403_v28, 0.0  ;;  %v2855_v27 = vld [vmem:[#allocation26_spill] sm:$0xff] }
 0x178   :  { %v1442_v42 = vmax.f32 %v1406_v29, 0.0  ;;  %v1355_v5 = vmax.f32 %v1354_v31, %v2844_v21  ;;  %v1357_v23 = vmax.f32 %v2845_v58, %v2058_v22  ;;  %v948_v41 = vpop.f32.mrb[67].mxu0  ;;  %v1236_v44 = vpop.f32.mrb[67].mxu1 }
 0x179   :  { %v1440_v57 = vmax.f32 %v1404_v19, 0.0  ;;  %v1349_v59 = vmax.f32 %v1348_v6, %v2846_v60  ;;  %v1351_v46 = vmax.f32 %v2847_v62, %v948_v41  ;;  %v2857_v19 = vld [vmem:[#allocation27_spill] sm:$0xff] }
 0x17a   :  { %v1856_v8 = vpack.c.bf16 %v1442_v42, %v1441_v1  ;;  %v1356_v45 = vmax.f32 %v1355_v5, %v2129_v63  ;;  %v1358_v47 = vmax.f32 %v1357_v23, %v2848_v9 }
 0x17b   :  { %v1851_v7 = vpack.c.bf16 %v1440_v57, %v1439_v43  ;;  %v1350_v2 = vmax.f32 %v1349_v59, %v1233_v15  ;;  %v1352_v32 = vmax.f32 %v1351_v46, %v2849_v10 }
 0x17c   :  { %1890 = vst [vmem:[%s2805_s3 + $0x68] sm:$0xff] %v1856_v8   ;;  %v1409_v11 = vadd.f32 %v2642_v12, %v1356_v45  ;;  %v1359_v14 = vmax.f32 %v1358_v47, %v2130_v56 }
 0x17d   :  { %1889 = vst [vmem:[%s2805_s3 + $0x60] sm:$0xff] %v1851_v7   ;;  %v1407_v16 = vadd.f32 %v2642_v12, %v1350_v2  ;;  %v1353_v34 = vmax.f32 %v1352_v32, %v1236_v44  ;;  %v2061_v24 = vpop.f32.mrb[68].mxu0  ;;  %v2133_v0 = vpop.f32.mrb[68].mxu1 }
 0x17e   :  { %v1410_v13 = vadd.f32 %v2642_v12, %v1359_v14  ;;  %v1366_v36 = vmax.f32 %v2850_v33, %v2061_v24  ;;  %v961_v35 = vpop.f32.mrb[69].mxu0  ;;  %v1249_v48 = vpop.f32.mrb[69].mxu1  ;;  %v1445_v39 = vmax.f32 %v1409_v11, 0.0 }
 0x17f   :  { %v1408_v38 = vadd.f32 %v2642_v12, %v1353_v34  ;;  %v1360_v37 = vmax.f32 %v2851_v18, %v961_v35  ;;  %v2062_v50 = vpop.f32.mrb[70].mxu0  ;;  %v2134_v26 = vpop.f32.mrb[70].mxu1  ;;  %v1443_v61 = vmax.f32 %v1407_v16, 0.0 }
 0x180   :  { %v1446_v3 = vmax.f32 %v1410_v13, 0.0  ;;  %v1367_v52 = vmax.f32 %v1366_v36, %v2852_v49  ;;  %v1369_v54 = vmax.f32 %v2853_v51, %v2062_v50  ;;  %v964_v20 = vpop.f32.mrb[71].mxu0  ;;  %v1252_v53 = vpop.f32.mrb[71].mxu1 }
 0x181   :  { %v1444_v55 = vmax.f32 %v1408_v38, 0.0  ;;  %v1361_v28 = vmax.f32 %v1360_v37, %v2854_v25  ;;  %v1363_v30 = vmax.f32 %v2855_v27, %v964_v20 }
 0x182   :  { %v1866_v63 = vpack.c.bf16 %v1446_v3, %v1445_v39  ;;  %v1368_v29 = vmax.f32 %v1367_v52, %v2133_v0  ;;  %v1370_v31 = vmax.f32 %v1369_v54, %v2856_v17 }
 0x183   :  { %v1861_v4 = vpack.c.bf16 %v1444_v55, %v1443_v61  ;;  %v1362_v15 = vmax.f32 %v1361_v28, %v1249_v48  ;;  %v1364_v40 = vmax.f32 %v1363_v30, %v2857_v19 }
 0x184   :  { %1892 = vst [vmem:[%s2805_s3 + $0x78] sm:$0xff] %v1866_v63   ;;  %v1413_v6 = vadd.f32 %v2642_v12, %v1368_v29  ;;  %v1371_v22 = vmax.f32 %v1370_v31, %v2134_v26 }
 0x185   :  { %1891 = vst [vmem:[%s2805_s3 + $0x70] sm:$0xff] %v1861_v4   ;;  %v1411_v56 = vadd.f32 %v2642_v12, %v1362_v15  ;;  %v1365_v1 = vmax.f32 %v1364_v40, %v1252_v53 }
 0x186   :  { %v1414_v42 = vadd.f32 %v2642_v12, %v1371_v22  ;;  %v1449_v5 = vmax.f32 %v1413_v6, 0.0 }
 0x187   :  { %v1412_v21 = vadd.f32 %v2642_v12, %v1365_v1  ;;  %v1447_v23 = vmax.f32 %v1411_v56, 0.0 }
 0x188   :  { %v1450_v58 = vmax.f32 %v1414_v42, 0.0 }
 0x189   :  { %v1448_v41 = vmax.f32 %v1412_v21, 0.0 }
 0x18a   :  { %v1876_v44 = vpack.c.bf16 %v1450_v58, %v1449_v5 }
 0x18b   :  { %v1871_v43 = vpack.c.bf16 %v1448_v41, %v1447_v23 }
 0x18c   :  { %1894 = vst [vmem:[%s2805_s3 + $0x88] sm:$0xff] %v1876_v44  }
 0x18d   :  { %1893 = vst [vmem:[%s2805_s3 + $0x80] sm:$0xff] %v1871_v43  }

// kernel: dam_debug_forward.3
= control target key start
LH: loop header
LB: loop body
LE: loop exit
PB: predicated region body
PF: predicated region fallthrough
CT: control target
= control target key end

     0   :  { %s4927_s0 = inlined_call_operand.vmem [shape: bf16[4,32,256], index: 0, kind: input, shape index: {}]   ;;  %s4928_s1 = inlined_call_operand.vmem [shape: bf16[256,128], index: 1, kind: input, shape index: {}]   ;;  %s4929_s2 = inlined_call_operand.vmem [shape: f32[1,128], index: 2, kind: input, shape index: {}]   ;;  %s4930_s3 = inlined_call_operand.vmem [shape: bf16[16,128,128], index: 3, kind: input, shape index: {}]   ;;  %s4931_s4 = inlined_call_operand.vmem [shape: f32[1,128], index: 4, kind: input, shape index: {}]   ;;  %s4932_s5 = inlined_call_operand.vmem [shape: bf16[128,128], index: 5, kind: input, shape index: {}]   ;;  %s4933_s6 = inlined_call_operand.vmem [shape: f32[1,128], index: 6, kind: input, shape index: {}]   ;;  %s4934_s7 = inlined_call_operand.vmem [shape: bf16[128,128], index: 7, kind: input, shape index: {}]   ;;  %s4935_s8 = inlined_call_operand.vmem [shape: f32[1,128], index: 8, kind: input, shape index: {}]   ;;  %s4936_s9 = inlined_call_operand.vmem [shape: bf16[128,128], index: 9, kind: input, shape index: {}]   ;;  %s4937_s10 = inlined_call_operand.vmem [shape: f32[1,128], index: 10, kind: input, shape index: {}]   ;;  %s4938_s11 = inlined_call_operand.vmem [shape: bf16[128,128], index: 11, kind: input, shape index: {}]   ;;  %s4939_s12 = inlined_call_operand.vmem [shape: f32[1,128], index: 12, kind: input, shape index: {}]   ;;  %s4940_s13 = inlined_call_operand.hbm [shape: f32[2,128], index: 13, kind: output, shape index: {}]  }
   0x1   :  { %v3732_v0 = vld [vmem:[%s4928_s1 + $0x40] sm:$0xff]   ;;  %v3734_v2 = vld [vmem:[%s4928_s1 + $0x48] sm:$0xff]   ;;  %v3736_v4 = vld [vmem:[%s4928_s1 + $0x50] sm:$0xff]  }
   0x2   :  { %v3733_v1 = vld [vmem:[%s4928_s1] sm:$0xff]   ;;  %3085 = vmatprep.subr.bf16.mxu0 %v3732_v0  ;;  %v3735_v3 = vld [vmem:[%s4928_s1 + $0x8] sm:$0xff]   ;;  %v3737_v5 = vld [vmem:[%s4928_s1 + $0x10] sm:$0xff]  }
   0x3   :  { %3086 = vmatpush3.bf16.msra.mxu0 %v3733_v1  ;;  %v3738_v6 = vld [vmem:[%s4928_s1 + $0x58] sm:$0xff]   ;;  %v3740_v8 = vld [vmem:[%s4928_s1 + $0x60] sm:$0xff]   ;;  %v3742_v10 = vld [vmem:[%s4928_s1 + $0x68] sm:$0xff]  }
   0x4   :  { %3087 = vmatprep.subr.bf16.mxu0 %v3734_v2  ;;  %v3739_v7 = vld [vmem:[%s4928_s1 + $0x18] sm:$0xff]   ;;  %v3741_v9 = vld [vmem:[%s4928_s1 + $0x20] sm:$0xff]   ;;  %v3743_v12 = vld [vmem:[%s4928_s1 + $0x28] sm:$0xff]  }
   0x5   :  { %v3750_v11 = vld [vmem:[%s4927_s0 + $0x4] ss:$8 sps:$4 sm:$0xff]   ;;  %v3744_v13 = vld [vmem:[%s4928_s1 + $0x70] sm:$0xff]   ;;  %v3746_v15 = vld [vmem:[%s4928_s1 + $0x78] sm:$0xff]  }
   0x6   :  { %302 = vmatprep.mubr.bf16.mxu0 %v3750_v11  ;;  %v3745_v14 = vld [vmem:[%s4928_s1 + $0x30] sm:$0xff]   ;;  %v3747_v16 = vld [vmem:[%s4928_s1 + $0x38] sm:$0xff]   ;;  %v3748_v17 = vld [vmem:[%s4927_s0] ss:$8 sps:$4 sm:$0xff]  }
   0x7   :  { %3088 = vmatpush3.bf16.msra.mxu0 %v3735_v3  ;;  %v3751_v18 = vld [vmem:[%s4927_s0 + $0x14] ss:$8 sps:$4 sm:$0xff]   ;;  %v3753_v19 = vld [vmem:[%s4927_s0 + $0x10] ss:$8 sps:$4 sm:$0xff]   ;;  %v3754_v20 = vld [vmem:[%s4927_s0 + $0x24] ss:$8 sps:$4 sm:$0xff]  }
   0x8   :  { %3089 = vmatprep.subr.bf16.mxu0 %v3736_v4  ;;  %v3756_v21 = vld [vmem:[%s4927_s0 + $0x20] ss:$8 sps:$4 sm:$0xff]   ;;  %v3757_v22 = vld [vmem:[%s4927_s0 + $0x34] ss:$8 sps:$4 sm:$0xff]   ;;  %v3759_v23 = vld [vmem:[%s4927_s0 + $0x30] ss:$8 sps:$4 sm:$0xff]  }
   0x9   :  { %v3760_v24 = vld [vmem:[%s4927_s0 + $0x44] ss:$8 sps:$4 sm:$0xff]   ;;  %v3762_v25 = vld [vmem:[%s4927_s0 + $0x40] ss:$8 sps:$4 sm:$0xff]   ;;  %v3763_v26 = vld [vmem:[%s4927_s0 + $0x54] ss:$8 sps:$4 sm:$0xff]  }
   0xa   :  { %v3765_v27 = vld [vmem:[%s4927_s0 + $0x50] ss:$8 sps:$4 sm:$0xff]   ;;  %v3766_v28 = vld [vmem:[%s4927_s0 + $0x64] ss:$8 sps:$4 sm:$0xff]   ;;  %v3768_v29 = vld [vmem:[%s4927_s0 + $0x60] ss:$8 sps:$4 sm:$0xff]  }
   0xb   :  { %3090 = vmatpush3.bf16.msra.mxu0 %v3737_v5  ;;  %v3769_v30 = vld [vmem:[%s4927_s0 + $0x74] ss:$8 sps:$4 sm:$0xff]   ;;  %v3771_v31 = vld [vmem:[%s4927_s0 + $0x70] ss:$8 sps:$4 sm:$0xff]  }
   0xc   :  { %3091 = vmatprep.subr.bf16.mxu0 %v3738_v6 }
   0xf   :  { %3092 = vmatpush3.bf16.msra.mxu0 %v3739_v7 }
  0x10   :  { %3093 = vmatprep.subr.bf16.mxu0 %v3740_v8 }
  0x13   :  { %3094 = vmatpush3.bf16.msra.mxu0 %v3741_v9 }
  0x14   :  { %3095 = vmatprep.subr.bf16.mxu0 %v3742_v10 }
  0x17   :  { %3096 = vmatpush3.bf16.msra.mxu0 %v3743_v12 }
  0x18   :  { %3097 = vmatprep.subr.bf16.mxu0 %v3744_v13 }
  0x1b   :  { %3098 = vmatpush3.bf16.msra.mxu0 %v3745_v14 }
  0x1c   :  { %3099 = vmatprep.subr.bf16.mxu0 %v3746_v15 }
  0x1f   :  { %3100 = vmatpush3.bf16.msra.mxu0 %v3747_v16 }
  0x22   :  { %303 = vmatmul.mubr.bf16.vlgmr.msra.gmra.mrb[0].mxu0 %v3748_v17 }
  0x23   :  { %310 = vmatprep.mubr.bf16.mxu0 %v3751_v18 }
  0x2a   :  { %311 = vmatmul.mubr.bf16.gmra.mrb[4].mxu0 %v3753_v19 }
  0x2b   :  { %318 = vmatprep.mubr.bf16.mxu0 %v3754_v20 }
  0x32   :  { %319 = vmatmul.mubr.bf16.gmra.mrb[8].mxu0 %v3756_v21 }
  0x33   :  { %326 = vmatprep.mubr.bf16.mxu0 %v3757_v22 }
  0x3a   :  { %327 = vmatmul.mubr.bf16.gmra.mrb[12].mxu0 %v3759_v23 }
  0x3b   :  { %334 = vmatprep.mubr.bf16.mxu0 %v3760_v24 }
  0x42   :  { %335 = vmatmul.mubr.bf16.gmra.mrb[16].mxu0 %v3762_v25 }
  0x43   :  { %342 = vmatprep.mubr.bf16.mxu0 %v3763_v26 }
  0x4a   :  { %343 = vmatmul.mubr.bf16.gmra.mrb[20].mxu0 %v3765_v27 }
  0x4b   :  { %350 = vmatprep.mubr.bf16.mxu0 %v3766_v28 }
  0x52   :  { %351 = vmatmul.mubr.bf16.gmra.mrb[24].mxu0 %v3768_v29 }
  0x53   :  { %358 = vmatprep.mubr.bf16.mxu0 %v3769_v30 }
  0x5a   :  { %359 = vmatmul.mubr.bf16.gmra.mrb[28].mxu0 %v3771_v31 }
  0x5b   :  { %18 = vsyncpa [#allocation3], 0  ;;  %v3772_v32 = vld [vmem:[%s4930_s3 + $0x40] sm:$0xff]   ;;  %v3956_v33 = vmov 0.0   ;;  %v3774_v35 = vld [vmem:[%s4930_s3 + $0x48] sm:$0xff]   ;;  %vm3957_vm0 = vmmov 0  }
  0x5c   :  { %3329 = vmatprep.subr.bf16.mxu1 %v3956_v33  ;;  %3369 = vmatprep.subr.bf16.mxu0 %v3956_v33  ;;  %v3773_v34 = vld [vmem:[%s4930_s3 + $0x80] sm:$0xff]   ;;  %v3775_v36 = vld [vmem:[%s4930_s3 + $0x88] sm:$0xff]   ;;  %v3776_v37 = vld [vmem:[%s4930_s3 + $0x50] sm:$0xff]   ;;  %vm434_vm1 = vcmask 1041409  }
  0x5d   :  { %3330 = vmatpush3.bf16.msra.mxu1 %v3772_v32  ;;  %3370 = vmatpush3.bf16.msra.mxu0 %v3773_v34  ;;  %v3777_v38 = vld [vmem:[%s4930_s3 + $0x90] sm:$0xff]   ;;  %v3778_v39 = vld [vmem:[%s4930_s3 + $0x58] sm:$0xff]   ;;  %v3780_v41 = vld [vmem:[%s4930_s3 + $0x60] sm:$0xff]  }
  0x5e   :  { %3331 = vmatprep.subr.bf16.mxu1 %v3956_v33  ;;  %3371 = vmatprep.subr.bf16.mxu0 %v3956_v33  ;;  %v3779_v40 = vld [vmem:[%s4930_s3 + $0x98] sm:$0xff]   ;;  %v3781_v42 = vld [vmem:[%s4930_s3 + $0xa0] sm:$0xff]   ;;  %v3782_v43 = vld [vmem:[%s4930_s3 + $0x68] sm:$0xff]  }
  0x5f   :  { %v3783_v44 = vld [vmem:[%s4930_s3 + $0xa8] sm:$0xff]   ;;  %v3784_v45 = vld [vmem:[%s4930_s3 + $0x70] sm:$0xff]   ;;  %v3786_v47 = vld [vmem:[%s4930_s3 + $0x78] sm:$0xff]   ;;  %3345 = vmatprep.mubr.msk.bf16.mxu1 %vm3957_vm0, %v3956_v33  ;;  %3385 = vmatprep.mubr.msk.bf16.mxu0 %vm3957_vm0, %v3956_v33 }
  0x60   :  { %v3785_v46 = vld [vmem:[%s4930_s3 + $0xb0] sm:$0xff]   ;;  %v3787_v48 = vld [vmem:[%s4930_s3 + $0xb8] sm:$0xff]   ;;  %v2679_v34 = vld [vmem:[%s4929_s2] ss:$0 sm:$0xff] }
  0x61   :  { %3332 = vmatpush3.bf16.msra.mxu1 %v3774_v35  ;;  %3372 = vmatpush3.bf16.msra.mxu0 %v3775_v36 }
  0x62   :  { %3333 = vmatprep.subr.bf16.mxu1 %v3956_v33  ;;  %3373 = vmatprep.subr.bf16.mxu0 %v3956_v33 }
  0x65   :  { %3334 = vmatpush3.bf16.msra.mxu1 %v3776_v37  ;;  %3374 = vmatpush3.bf16.msra.mxu0 %v3777_v38 }
  0x66   :  { %3335 = vmatprep.subr.bf16.mxu1 %v3956_v33  ;;  %3375 = vmatprep.subr.bf16.mxu0 %v3956_v33 }
  0x69   :  { %3336 = vmatpush3.bf16.msra.mxu1 %v3778_v39  ;;  %3376 = vmatpush3.bf16.msra.mxu0 %v3779_v40 }
  0x6a   :  { %3337 = vmatprep.subr.bf16.mxu1 %v3956_v33  ;;  %3377 = vmatprep.subr.bf16.mxu0 %v3956_v33 }
  0x6d   :  { %3338 = vmatpush3.bf16.msra.mxu1 %v3780_v41  ;;  %3378 = vmatpush3.bf16.msra.mxu0 %v3781_v42 }
  0x6e   :  { %3339 = vmatprep.subr.bf16.mxu1 %v3956_v33  ;;  %3379 = vmatprep.subr.bf16.mxu0 %v3956_v33 }
  0x71   :  { %3340 = vmatpush3.bf16.msra.mxu1 %v3782_v43  ;;  %3380 = vmatpush3.bf16.msra.mxu0 %v3783_v44 }
  0x72   :  { %3341 = vmatprep.subr.bf16.mxu1 %v3956_v33  ;;  %3381 = vmatprep.subr.bf16.mxu0 %v3956_v33 }
  0x75   :  { %3342 = vmatpush3.bf16.msra.mxu1 %v3784_v45  ;;  %3382 = vmatpush3.bf16.msra.mxu0 %v3785_v46 }
  0x76   :  { %3343 = vmatprep.subr.bf16.mxu1 %v3956_v33  ;;  %3383 = vmatprep.subr.bf16.mxu0 %v3956_v33 }
  0x79   :  { %3344 = vmatpush3.bf16.msra.mxu1 %v3786_v47  ;;  %3384 = vmatpush3.bf16.msra.mxu0 %v3787_v48 }
  0x7a   :  { %3349 = vmatprep.subr.bf16.mxu1 %v3956_v33  ;;  %3409 = vmatprep.subr.bf16.mxu0 %v3956_v33 }
  0xf5   :  { %v3101_v49 = vpop.f32.mrb[0].mxu0 }
  0xf6   :  { %v3102_v50 = vpop.f32.mrb[1].mxu0 }
  0xf7   :  { %v3103_v51 = vadd.f32 %v3102_v50, %v3101_v49  ;;  %v3104_v52 = vpop.f32.mrb[2].mxu0 }
  0xf8   :  { %v3105_v53 = vpop.f32.mrb[3].mxu0 }
  0xf9   :  { %v3106_v54 = vadd.f32 %v3105_v53, %v3104_v52 }
  0xfd   :  { %v3107_v55 = vpop.f32.mrb[4].mxu0 }
  0xfe   :  { %v3108_v56 = vpop.f32.mrb[5].mxu0 }
  0xff   :  { %v3109_v57 = vadd.f32 %v3108_v56, %v3107_v55  ;;  %v3110_v58 = vpop.f32.mrb[6].mxu0 }
 0x100   :  { %v3111_v59 = vpop.f32.mrb[7].mxu0 }
 0x101   :  { %v3112_v60 = vadd.f32 %v3111_v59, %v3110_v58 }
 0x105   :  { %v3113_v61 = vpop.f32.mrb[8].mxu0 }
 0x106   :  { %v3114_v62 = vpop.f32.mrb[9].mxu0 }
 0x107   :  { %v3115_v63 = vadd.f32 %v3114_v62, %v3113_v61  ;;  %v3116_v0 = vpop.f32.mrb[10].mxu0 }
 0x108   :  { %v3117_v1 = vpop.f32.mrb[11].mxu0 }
 0x109   :  { %v367_v2 = vmax.f32 %v3103_v51, %v3115_v63  ;;  %v3118_v3 = vadd.f32 %v3117_v1, %v3116_v0 }
 0x10b   :  { %v370_v4 = vmax.f32 %v3106_v54, %v3118_v3 }
 0x10d   :  { %v3119_v5 = vpop.f32.mrb[12].mxu0 }
 0x10e   :  { %v3120_v6 = vpop.f32.mrb[13].mxu0 }
 0x10f   :  { %v3121_v7 = vadd.f32 %v3120_v6, %v3119_v5  ;;  %v3122_v8 = vpop.f32.mrb[14].mxu0 }
 0x110   :  { %v3123_v9 = vpop.f32.mrb[15].mxu0 }
 0x111   :  { %v373_v10 = vmax.f32 %v3109_v57, %v3121_v7  ;;  %v3124_v11 = vadd.f32 %v3123_v9, %v3122_v8 }
 0x113   :  { %v376_v12 = vmax.f32 %v3112_v60, %v3124_v11 }
 0x115   :  { %v3125_v13 = vpop.f32.mrb[16].mxu0 }
 0x116   :  { %v3126_v14 = vpop.f32.mrb[17].mxu0 }
 0x117   :  { %v3127_v15 = vadd.f32 %v3126_v14, %v3125_v13  ;;  %v3128_v16 = vpop.f32.mrb[18].mxu0  ;;  %v3789_v13 = vld [vmem:[%s4930_s3 + $0x100] sm:$0xff]  }
 0x118   :  { %v3129_v17 = vpop.f32.mrb[19].mxu0 }
 0x119   :  { %v368_v18 = vmax.f32 %v367_v2, %v3127_v15  ;;  %v3130_v19 = vadd.f32 %v3129_v17, %v3128_v16 }
 0x11b   :  { %v371_v20 = vmax.f32 %v370_v4, %v3130_v19  ;;  %v3788_v4 = vld [vmem:[%s4930_s3] sm:$0xff]  }
 0x11d   :  { %v3131_v21 = vpop.f32.mrb[20].mxu0 }
 0x11e   :  { %v3132_v22 = vpop.f32.mrb[21].mxu0 }
 0x11f   :  { %v3133_v23 = vadd.f32 %v3132_v22, %v3131_v21  ;;  %v3134_v24 = vpop.f32.mrb[22].mxu0 }
 0x120   :  { %v3135_v25 = vpop.f32.mrb[23].mxu0 }
 0x121   :  { %v374_v26 = vmax.f32 %v373_v10, %v3133_v23  ;;  %v3136_v27 = vadd.f32 %v3135_v25, %v3134_v24 }
 0x123   :  { %v377_v28 = vmax.f32 %v376_v12, %v3136_v27 }
 0x125   :  { %v3137_v29 = vpop.f32.mrb[24].mxu0 }
 0x126   :  { %v3138_v30 = vpop.f32.mrb[25].mxu0 }
 0x127   :  { %v3139_v31 = vadd.f32 %v3138_v30, %v3137_v29  ;;  %v3140_v32 = vpop.f32.mrb[26].mxu0 }
 0x128   :  { %v3141_v35 = vpop.f32.mrb[27].mxu0 }
 0x129   :  { %v369_v36 = vmax.f32 %v368_v18, %v3139_v31  ;;  %v3142_v37 = vadd.f32 %v3141_v35, %v3140_v32 }
 0x12b   :  { %v386_v38 = vadd.f32 %v2679_v34, %v369_v36  ;;  %v372_v39 = vmax.f32 %v371_v20, %v3142_v37  ;;  %v3790_v20 = vld [vmem:[%s4930_s3 + $0x8] sm:$0xff]  }
 0x12d   :  { %v387_v40 = vadd.f32 %v2679_v34, %v372_v39  ;;  %v3143_v41 = vpop.f32.mrb[28].mxu0  ;;  %v390_v43 = vmax.f32 %v386_v38, 0.0  ;;  %v3792_v38 = vld [vmem:[%s4930_s3 + $0x10] sm:$0xff]  }
 0x12e   :  { %v3144_v42 = vpop.f32.mrb[29].mxu0 }
 0x12f   :  { %v391_v44 = vmax.f32 %v387_v40, 0.0  ;;  %v3145_v45 = vadd.f32 %v3144_v42, %v3143_v41  ;;  %v3146_v46 = vpop.f32.mrb[30].mxu0 }
 0x130   :  { %v3147_v47 = vpop.f32.mrb[31].mxu0 }
 0x131   :  { %v394_v48 = vpack.c.bf16 %v391_v44, %v390_v43  ;;  %v375_v49 = vmax.f32 %v374_v26, %v3145_v45  ;;  %v3148_v50 = vadd.f32 %v3147_v47, %v3146_v46  ;;  %v3793_v46 = vld [vmem:[%s4930_s3 + $0x110] sm:$0xff]  }
 0x133   :  { %v388_v51 = vadd.f32 %v2679_v34, %v375_v49  ;;  %v378_v52 = vmax.f32 %v377_v28, %v3148_v50  ;;  %v431_v54 = vunpack.c.l.b16 %v394_v48  ;;  %v4198_v58 = vunpack.c.h.b16 %v394_v48  ;;  %v3791_v28 = vld [vmem:[%s4930_s3 + $0x108] sm:$0xff]   ;;  %v3794_v50 = vld [vmem:[%s4930_s3 + $0x18] sm:$0xff]  }
 0x135   :  { %v389_v53 = vadd.f32 %v2679_v34, %v378_v52  ;;  %v392_v55 = vmax.f32 %v388_v51, 0.0  ;;  %v433_v61 = vrot.slane %v431_v54, 1  ;;  %v635_v62 = vrot.slane %v431_v54, 2  ;;  %v3795_v51 = vld [vmem:[%s4930_s3 + $0x118] sm:$0xff]   ;;  %v3796_v52 = vld [vmem:[%s4930_s3 + $0x20] sm:$0xff]  }
 0x136   :  { %v857_v63 = vrot.slane %v431_v54, 4  ;;  %v746_v0 = vrot.slane %v431_v54, 3  ;;  %v1079_v1 = vrot.slane %v431_v54, 6  ;;  %v968_v2 = vrot.slane %v431_v54, 5 }
 0x137   :  { %v393_v56 = vmax.f32 %v389_v53, 0.0  ;;  %v1190_v19 = vrot.slane %v431_v54, 7  ;;  %v1413_v24 = vrot.slane %v4198_v58, 1  ;;  %v1523_v26 = vrot.slane %v4198_v58, 2  ;;  %v3797_v53 = vld [vmem:[%s4930_s3 + $0x120] sm:$0xff]  }
 0x138   :  { %v1745_v31 = vrot.slane %v4198_v58, 4  ;;  %v1634_v35 = vrot.slane %v4198_v58, 3  ;;  %v1967_v37 = vrot.slane %v4198_v58, 6  ;;  %v1856_v41 = vrot.slane %v4198_v58, 5 }
 0x139   :  { %v395_v57 = vpack.c.bf16 %v393_v56, %v392_v55  ;;  %v2078_v44 = vrot.slane %v4198_v58, 7  ;;  %v3799_v55 = vld [vmem:[%s4930_s3 + $0x128] sm:$0xff]   ;;  %v3800_v56 = vld [vmem:[%s4930_s3 + $0x30] sm:$0xff]  }
 0x13b   :  { %v432_v59 = vunpack.c.l.b16 %v395_v57  ;;  %v4200_v60 = vunpack.c.h.b16 %v395_v57  ;;  %v3801_v57 = vld [vmem:[%s4930_s3 + $0x130] sm:$0xff]  }
 0x13d   :  { %v435_v3 = vsel %vm434_vm1, %v432_v59, %v433_v61  ;;  %v636_v5 = vrot.slane %v432_v59, 1  ;;  %v526_v6 = vrot.slane %v432_v59, 7  ;;  %v858_v7 = vrot.slane %v432_v59, 3 }
 0x13e   :  { %v436_v8 = vpack.c.b16 %v435_v3, %v435_v3  ;;  %v747_v9 = vrot.slane %v432_v59, 2  ;;  %v1080_v10 = vrot.slane %v432_v59, 5  ;;  %v969_v11 = vrot.slane %v432_v59, 4  ;;  %v3809_v3 = vld [vmem:[%s4930_s3 + $0x190] sm:$0xff]  }
 0x13f   :  { %v637_v12 = vsel %vm434_vm1, %v636_v5, %v635_v62  ;;  %v4211_v14 = vsel %vm434_vm1, %v526_v6, %v431_v54  ;;  %v4214_v15 = vsel %vm434_vm1, %v858_v7, %v857_v63  ;;  %v1303_v16 = vrot.slane %v4200_v60, 7  ;;  %v3798_v54 = vld [vmem:[%s4930_s3 + $0x28] sm:$0xff]   ;;  %v3805_v62 = vld [vmem:[%s4930_s3 + $0x180] sm:$0xff]   ;;  %v3811_v5 = vld [vmem:[%s4930_s3 + $0x198] sm:$0xff]  }
 0x140   :  { %3346 = vmatmul.mubr.bf16.vlgmr.msra.gmra.mrb[0].mxu1 %v436_v8  ;;  %v638_v17 = vpack.c.b16 %v637_v12, %v637_v12  ;;  %v4218_v18 = vsel %vm434_vm1, %v747_v9, %v746_v0  ;;  %v4226_v21 = vsel %vm434_vm1, %v1080_v10, %v1079_v1  ;;  %v4229_v22 = vsel %vm434_vm1, %v969_v11, %v968_v2  ;;  %v3806_v0 = vld [vmem:[%s4930_s3 + $0xc8] sm:$0xff]   ;;  %v3808_v2 = vld [vmem:[%s4930_s3 + $0xd0] sm:$0xff]   ;;  %v3812_v6 = vld [vmem:[%s4930_s3 + $0xe0] sm:$0xff]  }
 0x141   :  { %3350 = vmatpush3.bf16.msra.mxu1 %v3788_v4  ;;  %3365 = vmatprep.mubr.msk.bf16.mxu1 %vm3957_vm0, %v3956_v33  ;;  %v1191_v23 = vrot.slane %v432_v59, 6  ;;  %v4235_v25 = vsel %vm434_vm1, %v1303_v16, %v4198_v58  ;;  %v1524_v27 = vrot.slane %v4200_v60, 1  ;;  %v4249_v30 = vsel %vm434_vm1, %v4200_v60, %v1413_v24  ;;  %v3802_v58 = vld [vmem:[%s4930_s3 + $0x38] sm:$0xff]   ;;  %v3807_v1 = vld [vmem:[%s4930_s3 + $0x188] sm:$0xff]   ;;  %v3813_v7 = vld [vmem:[%s4930_s3 + $0x1a0] sm:$0xff]  }
 0x142   :  { %3386 = vmatmul.mubr.bf16.vlgmr.msra.gmra.mrb[32].mxu0 %v638_v17  ;;  %3351 = vmatprep.subr.bf16.mxu1 %v3956_v33  ;;  %v1746_v32 = vrot.slane %v4200_v60, 3  ;;  %v1635_v36 = vrot.slane %v4200_v60, 2  ;;  %v1968_v40 = vrot.slane %v4200_v60, 5  ;;  %v1857_v42 = vrot.slane %v4200_v60, 4  ;;  %v3803_v59 = vld [vmem:[%s4930_s3 + $0x138] sm:$0xff]   ;;  %v3814_v8 = vld [vmem:[%s4930_s3 + $0xe8] sm:$0xff]  }
 0x143   :  { %3410 = vmatpush3.bf16.msra.mxu0 %v3789_v13  ;;  %3425 = vmatprep.mubr.msk.bf16.mxu0 %vm3957_vm0, %v3956_v33  ;;  %v4245_v29 = vsel %vm434_vm1, %v1191_v23, %v1190_v19  ;;  %v4255_v34 = vsel %vm434_vm1, %v1524_v27, %v1523_v26  ;;  %v2079_v45 = vrot.slane %v4200_v60, 6  ;;  %v3804_v60 = vld [vmem:[%s4930_s3 + $0xc0] sm:$0xff]   ;;  %v528_v61 = vpack.c.b16 %v4211_v14, %v4211_v14  ;;  %v3810_v4 = vld [vmem:[%s4930_s3 + $0xd8] sm:$0xff]   ;;  %v3815_v9 = vld [vmem:[%s4930_s3 + $0x1a8] sm:$0xff]  }
 0x144   :  { %3411 = vmatprep.subr.bf16.mxu0 %v3956_v33  ;;  %v4264_v39 = vsel %vm434_vm1, %v1746_v32, %v1745_v31  ;;  %v4271_v43 = vsel %vm434_vm1, %v1635_v36, %v1634_v35  ;;  %v4279_v47 = vsel %vm434_vm1, %v1968_v40, %v1967_v37  ;;  %v4282_v48 = vsel %vm434_vm1, %v1857_v42, %v1856_v41  ;;  %v3816_v10 = vld [vmem:[%s4930_s3 + $0xf0] sm:$0xff]   ;;  %v3818_v12 = vld [vmem:[%s4930_s3 + $0xf8] sm:$0xff]   ;;  %v3820_v14 = vld [vmem:[%s4930_s3 + $0x140] sm:$0xff]  }
 0x145   :  { %3352 = vmatpush3.bf16.msra.mxu1 %v3790_v20  ;;  %v4286_v49 = vsel %vm434_vm1, %v2079_v45, %v2078_v44  ;;  %v860_v63 = vpack.c.b16 %v4214_v15, %v4214_v15  ;;  %v3817_v11 = vld [vmem:[%s4930_s3 + $0x1b0] sm:$0xff]   ;;  %v3819_v13 = vld [vmem:[%s4930_s3 + $0x1b8] sm:$0xff]   ;;  %v749_v15 = vpack.c.b16 %v4218_v18, %v4218_v18  ;;  %v3821_v16 = vld [vmem:[%s4930_s3 + $0x200] sm:$0xff]   ;;  %v1082_v17 = vpack.c.b16 %v4226_v21, %v4226_v21 }
 0x146   :  { %3353 = vmatprep.subr.bf16.mxu1 %v3956_v33  ;;  %v3822_v19 = vld [vmem:[%s4930_s3 + $0x148] sm:$0xff]   ;;  %v3824_v20 = vld [vmem:[%s4930_s3 + $0x150] sm:$0xff]   ;;  %v3826_v23 = vld [vmem:[%s4930_s3 + $0x158] sm:$0xff]   ;;  %v971_v40 = vpack.c.b16 %v4229_v22, %v4229_v22  ;;  %v1305_v42 = vpack.c.b16 %v4235_v25, %v4235_v25 }
 0x147   :  { %3412 = vmatpush3.bf16.msra.mxu0 %v3791_v28  ;;  %v3823_v18 = vld [vmem:[%s4930_s3 + $0x208] sm:$0xff]   ;;  %v3825_v21 = vld [vmem:[%s4930_s3 + $0x210] sm:$0xff]   ;;  %v3827_v24 = vld [vmem:[%s4930_s3 + $0x218] sm:$0xff]  }
 0x148   :  { %3413 = vmatprep.subr.bf16.mxu0 %v3956_v33  ;;  %v3828_v26 = vld [vmem:[%s4930_s3 + $0x160] sm:$0xff]   ;;  %v3830_v28 = vld [vmem:[%s4930_s3 + $0x168] sm:$0xff]   ;;  %v3832_v32 = vld [vmem:[%s4930_s3 + $0x170] sm:$0xff]  }
 0x149   :  { %3354 = vmatpush3.bf16.msra.mxu1 %v3792_v38  ;;  %v3829_v27 = vld [vmem:[%s4930_s3 + $0x220] sm:$0xff]   ;;  %v3831_v31 = vld [vmem:[%s4930_s3 + $0x228] sm:$0xff]   ;;  %v3833_v35 = vld [vmem:[%s4930_s3 + $0x230] sm:$0xff]  }
 0x14a   :  { %3355 = vmatprep.subr.bf16.mxu1 %v3956_v33  ;;  %v3834_v36 = vld [vmem:[%s4930_s3 + $0x178] sm:$0xff]   ;;  %v3836_v38 = vld [vmem:[%s4930_s3 + $0x1c0] sm:$0xff]   ;;  %v3838_v44 = vld [vmem:[%s4930_s3 + $0x1c8] sm:$0xff]  }
 0x14b   :  { %3414 = vmatpush3.bf16.msra.mxu0 %v3793_v46  ;;  %v3835_v37 = vld [vmem:[%s4930_s3 + $0x238] sm:$0xff]   ;;  %v3837_v41 = vld [vmem:[%s4930_s3 + $0x280] sm:$0xff]   ;;  %v3839_v22 = vld [vmem:[%s4930_s3 + $0x288] sm:$0xff]  }
 0x14c   :  { %3415 = vmatprep.subr.bf16.mxu0 %v3956_v33  ;;  %v3840_v25 = vld [vmem:[%s4930_s3 + $0x1d0] sm:$0xff]   ;;  %v3842_v46 = vld [vmem:[%s4930_s3 + $0x1d8] sm:$0xff]  }
 0x14d   :  { %3356 = vmatpush3.bf16.msra.mxu1 %v3794_v50  ;;  %v3841_v45 = vld [vmem:[%s4930_s3 + $0x290] sm:$0xff]   ;;  %v3843_v50 = vld [vmem:[%s4930_s3 + $0x298] sm:$0xff]  }
 0x14e   :  { %3357 = vmatprep.subr.bf16.mxu1 %v3956_v33 }
 0x14f   :  { %3416 = vmatpush3.bf16.msra.mxu0 %v3795_v51  ;;  %v3844_v51 = vld [vmem:[%s4930_s3 + $0x1e0] sm:$0xff]  }
 0x150   :  { %3417 = vmatprep.subr.bf16.mxu0 %v3956_v33 }
 0x151   :  { %3358 = vmatpush3.bf16.msra.mxu1 %v3796_v52  ;;  %v3845_v52 = vld [vmem:[%s4930_s3 + $0x2a0] sm:$0xff]  }
 0x152   :  { %3359 = vmatprep.subr.bf16.mxu1 %v3956_v33 }
 0x153   :  { %3418 = vmatpush3.bf16.msra.mxu0 %v3797_v53  ;;  %v3846_v53 = vld [vmem:[%s4930_s3 + $0x1e8] sm:$0xff]  }
 0x154   :  { %3419 = vmatprep.subr.bf16.mxu0 %v3956_v33 }
 0x155   :  { %3360 = vmatpush3.bf16.msra.mxu1 %v3798_v54  ;;  %v3847_v54 = vld [vmem:[%s4930_s3 + $0x2a8] sm:$0xff]  }
 0x156   :  { %3361 = vmatprep.subr.bf16.mxu1 %v3956_v33 }
 0x157   :  { %3420 = vmatpush3.bf16.msra.mxu0 %v3799_v55  ;;  %v3848_v55 = vld [vmem:[%s4930_s3 + $0x1f0] sm:$0xff]  }
 0x158   :  { %3421 = vmatprep.subr.bf16.mxu0 %v3956_v33 }
 0x159   :  { %3362 = vmatpush3.bf16.msra.mxu1 %v3800_v56  ;;  %v3849_v56 = vld [vmem:[%s4930_s3 + $0x2b0] sm:$0xff]  }
 0x15a   :  { %3363 = vmatprep.subr.bf16.mxu1 %v3956_v33 }
 0x15b   :  { %3422 = vmatpush3.bf16.msra.mxu0 %v3801_v57  ;;  %v3850_v57 = vld [vmem:[%s4930_s3 + $0x1f8] sm:$0xff]  }
 0x15c   :  { %3423 = vmatprep.subr.bf16.mxu0 %v3956_v33 }
 0x15d   :  { %3364 = vmatpush3.bf16.msra.mxu1 %v3802_v58  ;;  %v3851_v58 = vld [vmem:[%s4930_s3 + $0x2b8] sm:$0xff]  }
 0x15e   :  { %3389 = vmatprep.subr.bf16.mxu1 %v3956_v33 }
 0x15f   :  { %3424 = vmatpush3.bf16.msra.mxu0 %v3803_v59  ;;  %v3852_v59 = vld [vmem:[%s4930_s3 + $0x240] sm:$0xff]  }
 0x160   :  { %3366 = vmatmul.mubr.bf16.vlgmr.msra.gmra.mrb[4].mxu1 %v528_v61  ;;  %3449 = vmatprep.subr.bf16.mxu0 %v3956_v33  ;;  %v3853_v61 = vld [vmem:[%s4930_s3 + $0x300] sm:$0xff]  }
 0x161   :  { %3390 = vmatpush3.bf16.msra.mxu1 %v3804_v60  ;;  %3405 = vmatprep.mubr.msk.bf16.mxu1 %vm3957_vm0, %v3956_v33  ;;  %v1193_v60 = vpack.c.b16 %v4245_v29, %v4245_v29  ;;  %v3855_v29 = vld [vmem:[%s4930_s3 + $0x308] sm:$0xff]  }
 0x162   :  { %3426 = vmatmul.mubr.bf16.vlgmr.msra.gmra.mrb[36].mxu0 %v860_v63  ;;  %3391 = vmatprep.subr.bf16.mxu1 %v3956_v33  ;;  %v3854_v63 = vld [vmem:[%s4930_s3 + $0x248] sm:$0xff]  }
 0x163   :  { %3450 = vmatpush3.bf16.msra.mxu0 %v3805_v62  ;;  %3465 = vmatprep.mubr.msk.bf16.mxu0 %vm3957_vm0, %v3956_v33  ;;  %v1526_v62 = vpack.c.b16 %v4255_v34, %v4255_v34  ;;  %v3856_v34 = vld [vmem:[%s4930_s3 + $0x250] sm:$0xff]  }
 0x164   :  { %3451 = vmatprep.subr.bf16.mxu0 %v3956_v33 }
 0x165   :  { %3392 = vmatpush3.bf16.msra.mxu1 %v3806_v0  ;;  %v3857_v0 = vld [vmem:[%s4930_s3 + $0x310] sm:$0xff]  }
 0x166   :  { %3393 = vmatprep.subr.bf16.mxu1 %v3956_v33 }
 0x167   :  { %3452 = vmatpush3.bf16.msra.mxu0 %v3807_v1  ;;  %v3858_v1 = vld [vmem:[%s4930_s3 + $0x258] sm:$0xff]  }
 0x168   :  { %3453 = vmatprep.subr.bf16.mxu0 %v3956_v33 }
 0x169   :  { %3394 = vmatpush3.bf16.msra.mxu1 %v3808_v2  ;;  %v3859_v2 = vld [vmem:[%s4930_s3 + $0x318] sm:$0xff]  }
 0x16a   :  { %3395 = vmatprep.subr.bf16.mxu1 %v3956_v33 }
 0x16b   :  { %3454 = vmatpush3.bf16.msra.mxu0 %v3809_v3  ;;  %v3860_v3 = vld [vmem:[%s4930_s3 + $0x260] sm:$0xff]  }
 0x16c   :  { %3455 = vmatprep.subr.bf16.mxu0 %v3956_v33 }
 0x16d   :  { %3396 = vmatpush3.bf16.msra.mxu1 %v3810_v4  ;;  %v3861_v4 = vld [vmem:[%s4930_s3 + $0x320] sm:$0xff]  }
 0x16e   :  { %3397 = vmatprep.subr.bf16.mxu1 %v3956_v33 }
 0x16f   :  { %3456 = vmatpush3.bf16.msra.mxu0 %v3811_v5  ;;  %v3862_v5 = vld [vmem:[%s4930_s3 + $0x268] sm:$0xff]  }
 0x170   :  { %3457 = vmatprep.subr.bf16.mxu0 %v3956_v33 }
 0x171   :  { %3398 = vmatpush3.bf16.msra.mxu1 %v3812_v6  ;;  %v3863_v6 = vld [vmem:[%s4930_s3 + $0x328] sm:$0xff]  }
 0x172   :  { %3399 = vmatprep.subr.bf16.mxu1 %v3956_v33 }
 0x173   :  { %3458 = vmatpush3.bf16.msra.mxu0 %v3813_v7  ;;  %v3864_v7 = vld [vmem:[%s4930_s3 + $0x270] sm:$0xff]  }
 0x174   :  { %3459 = vmatprep.subr.bf16.mxu0 %v3956_v33 }
 0x175   :  { %3400 = vmatpush3.bf16.msra.mxu1 %v3814_v8  ;;  %v3865_v8 = vld [vmem:[%s4930_s3 + $0x330] sm:$0xff]  }
 0x176   :  { %3401 = vmatprep.subr.bf16.mxu1 %v3956_v33 }
 0x177   :  { %3460 = vmatpush3.bf16.msra.mxu0 %v3815_v9  ;;  %v3866_v9 = vld [vmem:[%s4930_s3 + $0x278] sm:$0xff]  }
 0x178   :  { %3461 = vmatprep.subr.bf16.mxu0 %v3956_v33 }
 0x179   :  { %3402 = vmatpush3.bf16.msra.mxu1 %v3816_v10  ;;  %v3867_v10 = vld [vmem:[%s4930_s3 + $0x338] sm:$0xff]  }
 0x17a   :  { %3403 = vmatprep.subr.bf16.mxu1 %v3956_v33 }
 0x17b   :  { %3462 = vmatpush3.bf16.msra.mxu0 %v3817_v11  ;;  %v3868_v11 = vld [vmem:[%s4930_s3 + $0x2c0] sm:$0xff]  }
 0x17c   :  { %3463 = vmatprep.subr.bf16.mxu0 %v3956_v33 }
 0x17d   :  { %3404 = vmatpush3.bf16.msra.mxu1 %v3818_v12  ;;  %v1415_v12 = vpack.c.b16 %v4249_v30, %v4249_v30  ;;  %v3871_v30 = vld [vmem:[%s4930_s3 + $0x388] sm:$0xff]  }
 0x17e   :  { %3429 = vmatprep.subr.bf16.mxu1 %v3956_v33 }
 0x17f   :  { %3464 = vmatpush3.bf16.msra.mxu0 %v3819_v13  ;;  %v3869_v13 = vld [vmem:[%s4930_s3 + $0x380] sm:$0xff]  }
 0x180   :  { %3406 = vmatmul.mubr.bf16.vlgmr.msra.gmra.mrb[8].mxu1 %v749_v15  ;;  %3489 = vmatprep.subr.bf16.mxu0 %v3956_v33  ;;  %v3870_v15 = vld [vmem:[%s4930_s3 + $0x2c8] sm:$0xff]  }
 0x181   :  { %3430 = vmatpush3.bf16.msra.mxu1 %v3820_v14  ;;  %3445 = vmatprep.mubr.msk.bf16.mxu1 %vm3957_vm0, %v3956_v33  ;;  %v1748_v14 = vpack.c.b16 %v4264_v39, %v4264_v39  ;;  %v3872_v39 = vld [vmem:[%s4930_s3 + $0x2d0] sm:$0xff]  }
 0x182   :  { %3466 = vmatmul.mubr.bf16.vlgmr.msra.gmra.mrb[40].mxu0 %v1082_v17  ;;  %3431 = vmatprep.subr.bf16.mxu1 %v3956_v33  ;;  %v3874_v17 = vld [vmem:[%s4930_s3 + $0x2d8] sm:$0xff]  }
 0x183   :  { %3490 = vmatpush3.bf16.msra.mxu0 %v3821_v16  ;;  %3505 = vmatprep.mubr.msk.bf16.mxu0 %vm3957_vm0, %v3956_v33  ;;  %v3873_v16 = vld [vmem:[%s4930_s3 + $0x390] sm:$0xff]  }
 0x184   :  { %3491 = vmatprep.subr.bf16.mxu0 %v3956_v33 }
 0x185   :  { %3432 = vmatpush3.bf16.msra.mxu1 %v3822_v19  ;;  %v3875_v19 = vld [vmem:[%s4930_s3 + $0x398] sm:$0xff]  }
 0x186   :  { %3433 = vmatprep.subr.bf16.mxu1 %v3956_v33 }
 0x187   :  { %3492 = vmatpush3.bf16.msra.mxu0 %v3823_v18  ;;  %v3876_v18 = vld [vmem:[%s4930_s3 + $0x2e0] sm:$0xff]  }
 0x188   :  { %3493 = vmatprep.subr.bf16.mxu0 %v3956_v33 }
 0x189   :  { %3434 = vmatpush3.bf16.msra.mxu1 %v3824_v20  ;;  %v3877_v20 = vld [vmem:[%s4930_s3 + $0x3a0] sm:$0xff]  }
 0x18a   :  { %3435 = vmatprep.subr.bf16.mxu1 %v3956_v33 }
 0x18b   :  { %3494 = vmatpush3.bf16.msra.mxu0 %v3825_v21  ;;  %v3878_v21 = vld [vmem:[%s4930_s3 + $0x2e8] sm:$0xff]  }
 0x18c   :  { %3495 = vmatprep.subr.bf16.mxu0 %v3956_v33 }
 0x18d   :  { %3436 = vmatpush3.bf16.msra.mxu1 %v3826_v23  ;;  %v3879_v23 = vld [vmem:[%s4930_s3 + $0x3a8] sm:$0xff]  }
 0x18e   :  { %3437 = vmatprep.subr.bf16.mxu1 %v3956_v33 }
 0x18f   :  { %3496 = vmatpush3.bf16.msra.mxu0 %v3827_v24  ;;  %v3880_v24 = vld [vmem:[%s4930_s3 + $0x2f0] sm:$0xff]  }
 0x190   :  { %3497 = vmatprep.subr.bf16.mxu0 %v3956_v33 }
 0x191   :  { %3438 = vmatpush3.bf16.msra.mxu1 %v3828_v26  ;;  %v3881_v26 = vld [vmem:[%s4930_s3 + $0x3b0] sm:$0xff]  }
 0x192   :  { %3439 = vmatprep.subr.bf16.mxu1 %v3956_v33 }
 0x193   :  { %3498 = vmatpush3.bf16.msra.mxu0 %v3829_v27  ;;  %v3882_v27 = vld [vmem:[%s4930_s3 + $0x2f8] sm:$0xff]  }
 0x194   :  { %3499 = vmatprep.subr.bf16.mxu0 %v3956_v33 }
 0x195   :  { %3440 = vmatpush3.bf16.msra.mxu1 %v3830_v28  ;;  %v3883_v28 = vld [vmem:[%s4930_s3 + $0x3b8] sm:$0xff]  }
 0x196   :  { %3441 = vmatprep.subr.bf16.mxu1 %v3956_v33 }
 0x197   :  { %3500 = vmatpush3.bf16.msra.mxu0 %v3831_v31  ;;  %v3884_v31 = vld [vmem:[%s4930_s3 + $0x340] sm:$0xff]  }
 0x198   :  { %3501 = vmatprep.subr.bf16.mxu0 %v3956_v33 }
 0x199   :  { %3442 = vmatpush3.bf16.msra.mxu1 %v3832_v32  ;;  %v1637_v32 = vpack.c.b16 %v4271_v43, %v4271_v43  ;;  %v3886_v43 = vld [vmem:[%s4930_s3 + $0x350] sm:$0xff]  }
 0x19a   :  { %3443 = vmatprep.subr.bf16.mxu1 %v3956_v33 }
 0x19b   :  { %3502 = vmatpush3.bf16.msra.mxu0 %v3833_v35  ;;  %v1970_v35 = vpack.c.b16 %v4279_v47, %v4279_v47  ;;  %v3887_v47 = vld [vmem:[%s4930_s3 + $0x358] sm:$0xff]  }
 0x19c   :  { %3503 = vmatprep.subr.bf16.mxu0 %v3956_v33 }
 0x19d   :  { %3444 = vmatpush3.bf16.msra.mxu1 %v3834_v36  ;;  %v3885_v36 = vld [vmem:[%s4930_s3 + $0x348] sm:$0xff]  }
 0x19e   :  { %3469 = vmatprep.subr.bf16.mxu1 %v3956_v33 }
 0x19f   :  { %3504 = vmatpush3.bf16.msra.mxu0 %v3835_v37  ;;  %v3888_v37 = vld [vmem:[%s4930_s3 + $0x360] sm:$0xff]  }
 0x1a0   :  { %3446 = vmatmul.mubr.bf16.vlgmr.msra.gmra.mrb[12].mxu1 %v971_v40  ;;  %3529 = vmatprep.subr.bf16.mxu0 %v3956_v33 }
 0x1a1   :  { %3470 = vmatpush3.bf16.msra.mxu1 %v3836_v38  ;;  %3485 = vmatprep.mubr.msk.bf16.mxu1 %vm3957_vm0, %v3956_v33  ;;  %v3889_v38 = vld [vmem:[%s4930_s3 + $0x368] sm:$0xff]  }
 0x1a2   :  { %3506 = vmatmul.mubr.bf16.vlgmr.msra.gmra.mrb[44].mxu0 %v1305_v42  ;;  %3471 = vmatprep.subr.bf16.mxu1 %v3956_v33 }
 0x1a3   :  { %3530 = vmatpush3.bf16.msra.mxu0 %v3837_v41  ;;  %3545 = vmatprep.mubr.msk.bf16.mxu0 %vm3957_vm0, %v3956_v33 }
 0x1a4   :  { %3531 = vmatprep.subr.bf16.mxu0 %v3956_v33 }
 0x1a5   :  { %3472 = vmatpush3.bf16.msra.mxu1 %v3838_v44 }
 0x1a6   :  { %3473 = vmatprep.subr.bf16.mxu1 %v3956_v33 }
 0x1a7   :  { %3532 = vmatpush3.bf16.msra.mxu0 %v3839_v22  ;;  %v3890_v22 = vld [vmem:[%s4930_s3 + $0x370] sm:$0xff]  }
 0x1a8   :  { %3533 = vmatprep.subr.bf16.mxu0 %v3956_v33 }
 0x1a9   :  { %3474 = vmatpush3.bf16.msra.mxu1 %v3840_v25 }
 0x1aa   :  { %3475 = vmatprep.subr.bf16.mxu1 %v3956_v33 }
 0x1ab   :  { %3534 = vmatpush3.bf16.msra.mxu0 %v3841_v45 }
 0x1ac   :  { %3535 = vmatprep.subr.bf16.mxu0 %v3956_v33 }
 0x1ad   :  { %3476 = vmatpush3.bf16.msra.mxu1 %v3842_v46 }
 0x1ae   :  { %3477 = vmatprep.subr.bf16.mxu1 %v3956_v33 }
 0x1af   :  { %3536 = vmatpush3.bf16.msra.mxu0 %v3843_v50 }
 0x1b0   :  { %3537 = vmatprep.subr.bf16.mxu0 %v3956_v33 }
 0x1b1   :  { %3478 = vmatpush3.bf16.msra.mxu1 %v3844_v51  ;;  %v3891_v51 = vld [vmem:[%s4930_s3 + $0x378] sm:$0xff]  }
 0x1b2   :  { %3479 = vmatprep.subr.bf16.mxu1 %v3956_v33 }
 0x1b3   :  { %3538 = vmatpush3.bf16.msra.mxu0 %v3845_v52  ;;  %v3892_v52 = vld [vmem:[%s4930_s3 + $0x3c0] sm:$0xff]  }
 0x1b4   :  { %3539 = vmatprep.subr.bf16.mxu0 %v3956_v33 }
 0x1b5   :  { %3480 = vmatpush3.bf16.msra.mxu1 %v3846_v53  ;;  %v1859_v53 = vpack.c.b16 %v4282_v48, %v4282_v48  ;;  %v3895_v48 = vld [vmem:[%s4930_s3 + $0x3d8] sm:$0xff]  }
 0x1b6   :  { %3481 = vmatprep.subr.bf16.mxu1 %v3956_v33 }
 0x1b7   :  { %3540 = vmatpush3.bf16.msra.mxu0 %v3847_v54  ;;  %v3893_v54 = vld [vmem:[%s4930_s3 + $0x3c8] sm:$0xff]  }
 0x1b8   :  { %3541 = vmatprep.subr.bf16.mxu0 %v3956_v33 }
 0x1b9   :  { %3482 = vmatpush3.bf16.msra.mxu1 %v3848_v55  ;;  %v3894_v55 = vld [vmem:[%s4930_s3 + $0x3d0] sm:$0xff]  }
 0x1ba   :  { %3483 = vmatprep.subr.bf16.mxu1 %v3956_v33 }
 0x1bb   :  { %3542 = vmatpush3.bf16.msra.mxu0 %v3849_v56  ;;  %v3896_v56 = vld [vmem:[%s4930_s3 + $0x3e0] sm:$0xff]  }
 0x1bc   :  { %3543 = vmatprep.subr.bf16.mxu0 %v3956_v33 }
 0x1bd   :  { %3484 = vmatpush3.bf16.msra.mxu1 %v3850_v57  ;;  %v3897_v57 = vld [vmem:[%s4930_s3 + $0x3e8] sm:$0xff]  }
 0x1be   :  { %3509 = vmatprep.subr.bf16.mxu1 %v3956_v33 }
 0x1bf   :  { %3544 = vmatpush3.bf16.msra.mxu0 %v3851_v58 }
 0x1c0   :  { %3486 = vmatmul.mubr.bf16.vlgmr.msra.gmra.mrb[16].mxu1 %v1193_v60  ;;  %3569 = vmatprep.subr.bf16.mxu0 %v3956_v33 }
 0x1c1   :  { %3510 = vmatpush3.bf16.msra.mxu1 %v3852_v59  ;;  %3525 = vmatprep.mubr.msk.bf16.mxu1 %vm3957_vm0, %v3956_v33 }
 0x1c2   :  { %3546 = vmatmul.mubr.bf16.vlgmr.msra.gmra.mrb[48].mxu0 %v1526_v62  ;;  %3511 = vmatprep.subr.bf16.mxu1 %v3956_v33 }
 0x1c3   :  { %3570 = vmatpush3.bf16.msra.mxu0 %v3853_v61  ;;  %3585 = vmatprep.mubr.msk.bf16.mxu0 %vm3957_vm0, %v3956_v33 }
 0x1c4   :  { %3571 = vmatprep.subr.bf16.mxu0 %v3956_v33 }
 0x1c5   :  { %3512 = vmatpush3.bf16.msra.mxu1 %v3854_v63  ;;  %v3898_v63 = vld [vmem:[%s4930_s3 + $0x3f0] sm:$0xff]  }
 0x1c6   :  { %3513 = vmatprep.subr.bf16.mxu1 %v3956_v33 }
 0x1c7   :  { %3572 = vmatpush3.bf16.msra.mxu0 %v3855_v29 }
 0x1c8   :  { %3573 = vmatprep.subr.bf16.mxu0 %v3956_v33 }
 0x1c9   :  { %3514 = vmatpush3.bf16.msra.mxu1 %v3856_v34 }
 0x1ca   :  { %3515 = vmatprep.subr.bf16.mxu1 %v3956_v33 }
 0x1cb   :  { %3574 = vmatpush3.bf16.msra.mxu0 %v3857_v0 }
 0x1cc   :  { %3575 = vmatprep.subr.bf16.mxu0 %v3956_v33 }
 0x1cd   :  { %3516 = vmatpush3.bf16.msra.mxu1 %v3858_v1 }
 0x1ce   :  { %3517 = vmatprep.subr.bf16.mxu1 %v3956_v33 }
 0x1cf   :  { %3576 = vmatpush3.bf16.msra.mxu0 %v3859_v2 }
 0x1d0   :  { %3577 = vmatprep.subr.bf16.mxu0 %v3956_v33 }
 0x1d1   :  { %3518 = vmatpush3.bf16.msra.mxu1 %v3860_v3  ;;  %v3899_v3 = vld [vmem:[%s4930_s3 + $0x3f8] sm:$0xff]  }
 0x1d2   :  { %3519 = vmatprep.subr.bf16.mxu1 %v3956_v33 }
 0x1d3   :  { %3578 = vmatpush3.bf16.msra.mxu0 %v3861_v4  ;;  %v2081_v4 = vpack.c.b16 %v4286_v49, %v4286_v49 }
 0x1d4   :  { %3579 = vmatprep.subr.bf16.mxu0 %v3956_v33 }
 0x1d5   :  { %3520 = vmatpush3.bf16.msra.mxu1 %v3862_v5 }
 0x1d6   :  { %3521 = vmatprep.subr.bf16.mxu1 %v3956_v33 }
 0x1d7   :  { %3580 = vmatpush3.bf16.msra.mxu0 %v3863_v6 }
 0x1d8   :  { %3581 = vmatprep.subr.bf16.mxu0 %v3956_v33 }
 0x1d9   :  { %3522 = vmatpush3.bf16.msra.mxu1 %v3864_v7 }
 0x1da   :  { %3523 = vmatprep.subr.bf16.mxu1 %v3956_v33 }
 0x1db   :  { %3582 = vmatpush3.bf16.msra.mxu0 %v3865_v8 }
 0x1dc   :  { %3583 = vmatprep.subr.bf16.mxu0 %v3956_v33 }
 0x1dd   :  { %3524 = vmatpush3.bf16.msra.mxu1 %v3866_v9 }
 0x1de   :  { %3549 = vmatprep.subr.bf16.mxu1 %v3956_v33 }
 0x1df   :  { %3584 = vmatpush3.bf16.msra.mxu0 %v3867_v10 }
 0x1e0   :  { %3526 = vmatmul.mubr.bf16.vlgmr.msra.gmra.mrb[20].mxu1 %v1415_v12  ;;  %3609 = vmatprep.subr.bf16.mxu0 %v3956_v33 }
 0x1e1   :  { %3550 = vmatpush3.bf16.msra.mxu1 %v3868_v11  ;;  %3565 = vmatprep.mubr.msk.bf16.mxu1 %vm3957_vm0, %v3956_v33 }
 0x1e2   :  { %3586 = vmatmul.mubr.bf16.vlgmr.msra.gmra.mrb[52].mxu0 %v1748_v14  ;;  %3551 = vmatprep.subr.bf16.mxu1 %v3956_v33 }
 0x1e3   :  { %3610 = vmatpush3.bf16.msra.mxu0 %v3869_v13  ;;  %3625 = vmatprep.mubr.msk.bf16.mxu0 %vm3957_vm0, %v3956_v33 }
 0x1e4   :  { %3611 = vmatprep.subr.bf16.mxu0 %v3956_v33 }
 0x1e5   :  { %3552 = vmatpush3.bf16.msra.mxu1 %v3870_v15 }
 0x1e6   :  { %3553 = vmatprep.subr.bf16.mxu1 %v3956_v33 }
 0x1e7   :  { %3612 = vmatpush3.bf16.msra.mxu0 %v3871_v30 }
 0x1e8   :  { %3613 = vmatprep.subr.bf16.mxu0 %v3956_v33 }
 0x1e9   :  { %3554 = vmatpush3.bf16.msra.mxu1 %v3872_v39 }
 0x1ea   :  { %3555 = vmatprep.subr.bf16.mxu1 %v3956_v33 }
 0x1eb   :  { %3614 = vmatpush3.bf16.msra.mxu0 %v3873_v16 }
 0x1ec   :  { %3615 = vmatprep.subr.bf16.mxu0 %v3956_v33 }
 0x1ed   :  { %3556 = vmatpush3.bf16.msra.mxu1 %v3874_v17 }
 0x1ee   :  { %3557 = vmatprep.subr.bf16.mxu1 %v3956_v33 }
 0x1ef   :  { %3616 = vmatpush3.bf16.msra.mxu0 %v3875_v19 }
 0x1f0   :  { %3617 = vmatprep.subr.bf16.mxu0 %v3956_v33 }
 0x1f1   :  { %3558 = vmatpush3.bf16.msra.mxu1 %v3876_v18 }
 0x1f2   :  { %3559 = vmatprep.subr.bf16.mxu1 %v3956_v33 }
 0x1f3   :  { %3618 = vmatpush3.bf16.msra.mxu0 %v3877_v20  ;;  %v3900_v20 = vld [vmem:[%s4932_s5] sm:$0xff]  }
 0x1f4   :  { %3619 = vmatprep.subr.bf16.mxu0 %v3956_v33 }
 0x1f5   :  { %3560 = vmatpush3.bf16.msra.mxu1 %v3878_v21 }
 0x1f6   :  { %3561 = vmatprep.subr.bf16.mxu1 %v3956_v33 }
 0x1f7   :  { %3620 = vmatpush3.bf16.msra.mxu0 %v3879_v23 }
 0x1f8   :  { %3621 = vmatprep.subr.bf16.mxu0 %v3956_v33 }
 0x1f9   :  { %3562 = vmatpush3.bf16.msra.mxu1 %v3880_v24  ;;  %v3901_v24 = vld [vmem:[%s4932_s5 + $0x8] sm:$0xff]  }
 0x1fa   :  { %3563 = vmatprep.subr.bf16.mxu1 %v3956_v33 }
 0x1fb   :  { %3622 = vmatpush3.bf16.msra.mxu0 %v3881_v26  ;;  %v3902_v26 = vld [vmem:[%s4932_s5 + $0x10] sm:$0xff]  }
 0x1fc   :  { %3623 = vmatprep.subr.bf16.mxu0 %v3956_v33 }
 0x1fd   :  { %3564 = vmatpush3.bf16.msra.mxu1 %v3882_v27  ;;  %v3903_v27 = vld [vmem:[%s4932_s5 + $0x18] sm:$0xff]  }
 0x1fe   :  { %3589 = vmatprep.subr.bf16.mxu1 %v3956_v33 }
 0x1ff   :  { %3624 = vmatpush3.bf16.msra.mxu0 %v3883_v28  ;;  %v3904_v28 = vld [vmem:[%s4932_s5 + $0x20] sm:$0xff]  }
 0x200   :  { %3566 = vmatmul.mubr.bf16.vlgmr.msra.gmra.mrb[24].mxu1 %v1637_v32  ;;  %3649 = vmatprep.subr.bf16.mxu0 %v3956_v33 }
 0x201   :  { %3590 = vmatpush3.bf16.msra.mxu1 %v3884_v31  ;;  %3605 = vmatprep.mubr.msk.bf16.mxu1 %vm3957_vm0, %v3956_v33  ;;  %v3905_v31 = vld [vmem:[%s4932_s5 + $0x28] sm:$0xff]  }
 0x202   :  { %3626 = vmatmul.mubr.bf16.vlgmr.msra.gmra.mrb[56].mxu0 %v1970_v35  ;;  %3591 = vmatprep.subr.bf16.mxu1 %v3956_v33 }
 0x203   :  { %3665 = vmatprep.mubr.msk.bf16.mxu0 %vm3957_vm0, %v3956_v33  ;;  %3650 = vmatpush3.bf16.msra.mxu0 %v3900_v20  ;;  %v3916_v20 = vld [vmem:[%s4936_s9] sm:$0xff]  }
 0x204   :  { %3651 = vmatprep.subr.bf16.mxu0 %v3956_v33 }
 0x205   :  { %3592 = vmatpush3.bf16.msra.mxu1 %v3885_v36 }
 0x206   :  { %3593 = vmatprep.subr.bf16.mxu1 %v3956_v33 }
 0x207   :  { %3652 = vmatpush3.bf16.msra.mxu0 %v3901_v24  ;;  %v3919_v24 = vld [vmem:[%s4936_s9 + $0x18] sm:$0xff]  }
 0x208   :  { %3653 = vmatprep.subr.bf16.mxu0 %v3956_v33 }
 0x209   :  { %3594 = vmatpush3.bf16.msra.mxu1 %v3886_v43 }
 0x20a   :  { %3595 = vmatprep.subr.bf16.mxu1 %v3956_v33 }
 0x20b   :  { %3654 = vmatpush3.bf16.msra.mxu0 %v3902_v26  ;;  %v3920_v26 = vld [vmem:[%s4936_s9 + $0x20] sm:$0xff]  }
 0x20c   :  { %3655 = vmatprep.subr.bf16.mxu0 %v3956_v33 }
 0x20d   :  { %3596 = vmatpush3.bf16.msra.mxu1 %v3887_v47 }
 0x20e   :  { %3597 = vmatprep.subr.bf16.mxu1 %v3956_v33 }
 0x20f   :  { %3656 = vmatpush3.bf16.msra.mxu0 %v3903_v27  ;;  %v3921_v27 = vld [vmem:[%s4936_s9 + $0x28] sm:$0xff]  }
 0x210   :  { %3657 = vmatprep.subr.bf16.mxu0 %v3956_v33 }
 0x211   :  { %3598 = vmatpush3.bf16.msra.mxu1 %v3888_v37 }
 0x212   :  { %3599 = vmatprep.subr.bf16.mxu1 %v3956_v33 }
 0x213   :  { %v520_v40 = vpop.f32.mrb[0].mxu1  ;;  %3658 = vmatpush3.bf16.msra.mxu0 %v3904_v28  ;;  %v3049_v28 = vld [vmem:[%s4933_s6] ss:$0 sm:$0xff] }
 0x214   :  { %v3347_v41 = vpop.f32.mrb[1].mxu1  ;;  %3659 = vmatprep.subr.bf16.mxu0 %v3956_v33 }
 0x215   :  { %3600 = vmatpush3.bf16.msra.mxu1 %v3889_v38  ;;  %v523_v42 = vpop.f32.mrb[2].mxu1  ;;  %v722_v44 = vpop.f32.mrb[32].mxu0 }
 0x216   :  { %v3348_v25 = vpop.f32.mrb[3].mxu1  ;;  %v3387_v45 = vpop.f32.mrb[33].mxu0  ;;  %3601 = vmatprep.subr.bf16.mxu1 %v3956_v33 }
 0x217   :  { %v725_v46 = vpop.f32.mrb[34].mxu0  ;;  %3660 = vmatpush3.bf16.msra.mxu0 %v3905_v31  ;;  %v3908_v25 = vld [vmem:[%s4934_s7] sm:$0xff]   ;;  %v3909_v45 = vld [vmem:[%s4934_s7 + $0x8] sm:$0xff]  }
 0x218   :  { %v3388_v50 = vpop.f32.mrb[35].mxu0  ;;  %3661 = vmatprep.subr.bf16.mxu0 %v3956_v33  ;;  %v3910_v46 = vld [vmem:[%s4934_s7 + $0x10] sm:$0xff]  }
 0x219   :  { %3602 = vmatpush3.bf16.msra.mxu1 %v3890_v22  ;;  %v3907_v22 = vld [vmem:[%s4932_s5 + $0x38] sm:$0xff]  }
 0x21a   :  { %3603 = vmatprep.subr.bf16.mxu1 %v3956_v33  ;;  %v3911_v50 = vld [vmem:[%s4934_s7 + $0x18] sm:$0xff]  }
 0x21d   :  { %3604 = vmatpush3.bf16.msra.mxu1 %v3891_v51  ;;  %v3912_v51 = vld [vmem:[%s4934_s7 + $0x20] sm:$0xff]  }
 0x21e   :  { %3629 = vmatprep.subr.bf16.mxu1 %v3956_v33 }
 0x220   :  { %3606 = vmatmul.mubr.bf16.vlgmr.msra.gmra.mrb[28].mxu1 %v1859_v53 }
 0x221   :  { %3630 = vmatpush3.bf16.msra.mxu1 %v3892_v52  ;;  %3645 = vmatprep.mubr.msk.bf16.mxu1 %vm3957_vm0, %v3956_v33  ;;  %v3913_v52 = vld [vmem:[%s4934_s7 + $0x28] sm:$0xff]  }
 0x222   :  { %3631 = vmatprep.subr.bf16.mxu1 %v3956_v33 }
 0x225   :  { %3632 = vmatpush3.bf16.msra.mxu1 %v3893_v54 }
 0x226   :  { %3633 = vmatprep.subr.bf16.mxu1 %v3956_v33 }
 0x229   :  { %3634 = vmatpush3.bf16.msra.mxu1 %v3894_v55 }
 0x22a   :  { %3635 = vmatprep.subr.bf16.mxu1 %v3956_v33 }
 0x22d   :  { %3636 = vmatpush3.bf16.msra.mxu1 %v3895_v48 }
 0x22e   :  { %3637 = vmatprep.subr.bf16.mxu1 %v3956_v33 }
 0x231   :  { %3638 = vmatpush3.bf16.msra.mxu1 %v3896_v56 }
 0x232   :  { %3639 = vmatprep.subr.bf16.mxu1 %v3956_v33 }
 0x233   :  { %v612_v58 = vpop.f32.mrb[4].mxu1 }
 0x234   :  { %v613_v59 = vadd.f32 %v612_v58, %v520_v40  ;;  %v3367_v60 = vpop.f32.mrb[5].mxu1 }
 0x235   :  { %v615_v61 = vpop.f32.mrb[6].mxu1  ;;  %v944_v62 = vpop.f32.mrb[36].mxu0  ;;  %3640 = vmatpush3.bf16.msra.mxu1 %v3897_v57 }
 0x236   :  { %v3368_v29 = vpop.f32.mrb[7].mxu1  ;;  %v3427_v34 = vpop.f32.mrb[37].mxu0  ;;  %3641 = vmatprep.subr.bf16.mxu1 %v3956_v33  ;;  %v728_v0 = vadd.f32 %v722_v44, %v613_v59  ;;  %v3906_v44 = vld [vmem:[%s4932_s5 + $0x30] sm:$0xff]  }
 0x237   :  { %v947_v1 = vpop.f32.mrb[38].mxu0  ;;  %3662 = vmatpush3.bf16.msra.mxu0 %v3906_v44  ;;  %v3926_v44 = vld [vmem:[%s4938_s11 + $0x10] sm:$0xff]  }
 0x238   :  { %v3428_v2 = vpop.f32.mrb[39].mxu0  ;;  %3663 = vmatprep.subr.bf16.mxu0 %v3956_v33 }
 0x239   :  { %3642 = vmatpush3.bf16.msra.mxu1 %v3898_v63 }
 0x23a   :  { %3643 = vmatprep.subr.bf16.mxu1 %v3956_v33 }
 0x23b   :  { %3664 = vmatpush3.bf16.msra.mxu0 %v3907_v22  ;;  %v3927_v22 = vld [vmem:[%s4938_s11 + $0x18] sm:$0xff]  }
 0x23c   :  { %3689 = vmatprep.subr.bf16.mxu0 %v3956_v33 }
 0x23d   :  { %3644 = vmatpush3.bf16.msra.mxu1 %v3899_v3 }
 0x23e   :  { %3669 = vmatprep.subr.bf16.mxu1 %v3956_v33 }
 0x240   :  { %3646 = vmatmul.mubr.bf16.vlgmr.msra.gmra.mrb[32].mxu1 %v2081_v4 }
 0x241   :  { %3685 = vmatprep.mubr.msk.bf16.mxu1 %vm3957_vm0, %v3956_v33  ;;  %3670 = vmatpush3.bf16.msra.mxu1 %v3908_v25  ;;  %v3928_v25 = vld [vmem:[%s4938_s11 + $0x20] sm:$0xff]  }
 0x242   :  { %3671 = vmatprep.subr.bf16.mxu1 %v3956_v33 }
 0x245   :  { %3672 = vmatpush3.bf16.msra.mxu1 %v3909_v45  ;;  %v3929_v45 = vld [vmem:[%s4938_s11 + $0x28] sm:$0xff]  }
 0x246   :  { %3673 = vmatprep.subr.bf16.mxu1 %v3956_v33 }
 0x249   :  { %3674 = vmatpush3.bf16.msra.mxu1 %v3910_v46  ;;  %v3058_v46 = vld [vmem:[%s4935_s8] ss:$0 sm:$0xff] }
 0x24a   :  { %3675 = vmatprep.subr.bf16.mxu1 %v3956_v33 }
 0x24d   :  { %3676 = vmatpush3.bf16.msra.mxu1 %v3911_v50 }
 0x24e   :  { %3677 = vmatprep.subr.bf16.mxu1 %v3956_v33 }
 0x251   :  { %3678 = vmatpush3.bf16.msra.mxu1 %v3912_v51 }
 0x252   :  { %3679 = vmatprep.subr.bf16.mxu1 %v3956_v33 }
 0x253   :  { %v833_v5 = vpop.f32.mrb[8].mxu1 }
 0x254   :  { %v839_v6 = vadd.f32 %v833_v5, %v728_v0  ;;  %v3407_v7 = vpop.f32.mrb[9].mxu1 }
 0x255   :  { %v836_v8 = vpop.f32.mrb[10].mxu1  ;;  %v1166_v9 = vpop.f32.mrb[40].mxu0  ;;  %3680 = vmatpush3.bf16.msra.mxu1 %v3913_v52 }
 0x256   :  { %v3408_v10 = vpop.f32.mrb[11].mxu1  ;;  %v3467_v11 = vpop.f32.mrb[41].mxu0  ;;  %v950_v12 = vadd.f32 %v944_v62, %v839_v6  ;;  %3681 = vmatprep.subr.bf16.mxu1 %v3956_v33 }
 0x257   :  { %v1169_v13 = vpop.f32.mrb[42].mxu0 }
 0x258   :  { %v3468_v14 = vpop.f32.mrb[43].mxu0  ;;  %v3048_v13 = vld [vmem:[%s4931_s4] ss:$0 sm:$0xff] }
 0x273   :  { %v1055_v15 = vpop.f32.mrb[12].mxu1 }
 0x274   :  { %v1061_v30 = vadd.f32 %v1055_v15, %v950_v12  ;;  %v3447_v39 = vpop.f32.mrb[13].mxu1 }
 0x275   :  { %v1058_v49 = vpop.f32.mrb[14].mxu1  ;;  %v1389_v16 = vpop.f32.mrb[44].mxu0 }
 0x276   :  { %v3448_v17 = vpop.f32.mrb[15].mxu1  ;;  %v3507_v19 = vpop.f32.mrb[45].mxu0  ;;  %v1172_v18 = vadd.f32 %v1166_v9, %v1061_v30 }
 0x277   :  { %v1392_v21 = vpop.f32.mrb[46].mxu0  ;;  %v3914_v19 = vld [vmem:[%s4934_s7 + $0x30] sm:$0xff]  }
 0x278   :  { %v3508_v23 = vpop.f32.mrb[47].mxu0  ;;  %3682 = vmatpush3.bf16.msra.mxu1 %v3914_v19  ;;  %v3917_v21 = vld [vmem:[%s4936_s9 + $0x8] sm:$0xff]  }
 0x279   :  { %3683 = vmatprep.subr.bf16.mxu1 %v3956_v33  ;;  %v3918_v23 = vld [vmem:[%s4936_s9 + $0x10] sm:$0xff]  }
 0x293   :  { %v1277_v32 = vpop.f32.mrb[16].mxu1 }
 0x294   :  { %v1283_v35 = vadd.f32 %v1277_v32, %v1172_v18  ;;  %v3487_v36 = vpop.f32.mrb[17].mxu1  ;;  %v3915_v18 = vld [vmem:[%s4934_s7 + $0x38] sm:$0xff]  }
 0x295   :  { %v1280_v43 = vpop.f32.mrb[18].mxu1  ;;  %v1610_v47 = vpop.f32.mrb[48].mxu0  ;;  %3684 = vmatpush3.bf16.msra.mxu1 %v3915_v18 }
 0x296   :  { %v3488_v37 = vpop.f32.mrb[19].mxu1  ;;  %v3547_v38 = vpop.f32.mrb[49].mxu0  ;;  %v1395_v40 = vadd.f32 %v1389_v16, %v1283_v35  ;;  %3709 = vmatprep.subr.bf16.mxu1 %v3956_v33 }
 0x297   :  { %v1613_v41 = vpop.f32.mrb[50].mxu0  ;;  %v3922_v38 = vld [vmem:[%s4936_s9 + $0x30] sm:$0xff]  }
 0x298   :  { %v3548_v42 = vpop.f32.mrb[51].mxu0  ;;  %v3924_v41 = vld [vmem:[%s4938_s11] sm:$0xff]  }
 0x299   :  { %v3925_v42 = vld [vmem:[%s4938_s11 + $0x8] sm:$0xff]  }
 0x2b3   :  { %v1499_v53 = vpop.f32.mrb[20].mxu1 }
 0x2b4   :  { %v1505_v54 = vadd.f32 %v1499_v53, %v1395_v40  ;;  %v3527_v55 = vpop.f32.mrb[21].mxu1  ;;  %v3923_v40 = vld [vmem:[%s4936_s9 + $0x38] sm:$0xff]  }
 0x2b5   :  { %v1502_v48 = vpop.f32.mrb[22].mxu1  ;;  %v1832_v56 = vpop.f32.mrb[52].mxu0 }
 0x2b6   :  { %v3528_v57 = vpop.f32.mrb[23].mxu1  ;;  %v3587_v58 = vpop.f32.mrb[53].mxu0  ;;  %v1616_v59 = vadd.f32 %v1610_v47, %v1505_v54 }
 0x2b7   :  { %v1835_v60 = vpop.f32.mrb[54].mxu0  ;;  %v3931_v57 = vld [vmem:[%s4938_s11 + $0x38] sm:$0xff]   ;;  %v3067_v58 = vld [vmem:[%s4937_s10] ss:$0 sm:$0xff] }
 0x2b8   :  { %v3588_v61 = vpop.f32.mrb[55].mxu0 }
 0x2d3   :  { %v1721_v62 = vpop.f32.mrb[24].mxu1 }
 0x2d4   :  { %v1727_v63 = vadd.f32 %v1721_v62, %v1616_v59  ;;  %v3567_v29 = vpop.f32.mrb[25].mxu1 }
 0x2d5   :  { %v1724_v34 = vpop.f32.mrb[26].mxu1  ;;  %v2054_v0 = vpop.f32.mrb[56].mxu0 }
 0x2d6   :  { %v3568_v1 = vpop.f32.mrb[27].mxu1  ;;  %v3627_v2 = vpop.f32.mrb[57].mxu0  ;;  %v1838_v3 = vadd.f32 %v1832_v56, %v1727_v63  ;;  %v3930_v56 = vld [vmem:[%s4938_s11 + $0x30] sm:$0xff]   ;;  %s3958_s11 = smov [#allocation2]  }
 0x2d7   :  { %v2057_v4 = vpop.f32.mrb[58].mxu0  ;;  %s2639_s18 = sshll.u32 %s3958_s11, 4  ;;  %s2640_s18 = int_to_ptr.vmem [resolvable:$true] %s2639_s18 }
 0x2d8   :  { %v3628_v5 = vpop.f32.mrb[59].mxu0  ;;  %s3932_s10 = scalar_lea.vmem %s2640_s18, 32  ;;  %p3937_p1 = scmp.lt.s32.totalorder %s2640_s18, %s2640_s18 }
 0x2d9   :  { %p3933_p0 = scmp.ne.s32.totalorder %s2640_s18, %s3932_s10  ;;  %p3938_p2 = scmp.lt.s32.totalorder %s3932_s10, %s3932_s10 }
 0x2db   :  { %p3939_p3 = por %p3938_p2, %p3937_p1 }
 0x2dd   :  { %p3940_p4 = pnand %p3939_p3, %p3933_p0 }
 0x2f3   :  { %v1943_v6 = vpop.f32.mrb[28].mxu1 }
 0x2f4   :  { %v1949_v7 = vadd.f32 %v1943_v6, %v1838_v3  ;;  %v3607_v8 = vpop.f32.mrb[29].mxu1 }
 0x2f5   :  { %v1946_v9 = vpop.f32.mrb[30].mxu1 }
 0x2f6   :  { %v3608_v10 = vpop.f32.mrb[31].mxu1  ;;  %v2060_v11 = vadd.f32 %v2054_v0, %v1949_v7  ;;  %v3076_v0 = vld [vmem:[%s4939_s12] ss:$0 sm:$0xff] }
 0x313   :  { %v2165_v12 = vpop.f32.mrb[32].mxu1 }
 0x314   :  { %v2171_v14 = vadd.f32 %v2165_v12, %v2060_v11  ;;  %v3647_v15 = vpop.f32.mrb[33].mxu1 }
 0x315   :  { %v2168_v30 = vpop.f32.mrb[34].mxu1 }
 0x316   :  { %v2179_v39 = vadd.f32 %v3048_v13, %v2171_v14  ;;  %v3648_v49 = vpop.f32.mrb[35].mxu1 }
 0x318   :  { %v2180_v16 = vmax.f32 %v2179_v39, 0.0 }
 0x31a   :  { %v2181_v17 = vpack.c.bf16 %v2180_v16, %v2180_v16 }
 0x31c   :  { %3666 = vmatmul.mubr.bf16.vlgmr.msra.gmra.mrb[60].mxu0 %v2181_v17 }
 0x31d   :  { %3705 = vmatprep.mubr.msk.bf16.mxu0 %vm3957_vm0, %v3956_v33  ;;  %3690 = vmatpush3.bf16.msra.mxu0 %v3916_v20 }
 0x31e   :  { %3691 = vmatprep.subr.bf16.mxu0 %v3956_v33 }
 0x321   :  { %3692 = vmatpush3.bf16.msra.mxu0 %v3917_v21 }
 0x322   :  { %3693 = vmatprep.subr.bf16.mxu0 %v3956_v33 }
 0x325   :  { %3694 = vmatpush3.bf16.msra.mxu0 %v3918_v23 }
 0x326   :  { %3695 = vmatprep.subr.bf16.mxu0 %v3956_v33 }
 0x329   :  { %3696 = vmatpush3.bf16.msra.mxu0 %v3919_v24 }
 0x32a   :  { %3697 = vmatprep.subr.bf16.mxu0 %v3956_v33 }
 0x32d   :  { %3698 = vmatpush3.bf16.msra.mxu0 %v3920_v26 }
 0x32e   :  { %3699 = vmatprep.subr.bf16.mxu0 %v3956_v33 }
 0x331   :  { %3700 = vmatpush3.bf16.msra.mxu0 %v3921_v27 }
 0x332   :  { %3701 = vmatprep.subr.bf16.mxu0 %v3956_v33 }
 0x335   :  { %3702 = vmatpush3.bf16.msra.mxu0 %v3922_v38 }
 0x336   :  { %3703 = vmatprep.subr.bf16.mxu0 %v3956_v33 }
 0x339   :  { %3704 = vmatpush3.bf16.msra.mxu0 %v3923_v40 }
 0x3ef   :  { %v2287_v31 = vpop.f32.mrb[60].mxu0 }
 0x3f0   :  { %v2288_v32 = vadd.f32 %v3049_v28, %v2287_v31  ;;  %v3667_v35 = vpop.f32.mrb[61].mxu0 }
 0x3f1   :  { %v2290_v36 = vpop.f32.mrb[62].mxu0 }
 0x3f2   :  { %v2293_v43 = vmax.f32 %v2288_v32, 0.0  ;;  %v3668_v47 = vpop.f32.mrb[63].mxu0 }
 0x3f4   :  { %v2294_v37 = vpack.c.bf16 %v2293_v43, %v2293_v43 }
 0x3f6   :  { %3686 = vmatmul.mubr.bf16.vlgmr.msra.gmra.mrb[36].mxu1 %v2294_v37 }
 0x3f7   :  { %3725 = vmatprep.mubr.msk.bf16.mxu1 %vm3957_vm0, %v3956_v33  ;;  %3710 = vmatpush3.bf16.msra.mxu1 %v3924_v41 }
 0x3f8   :  { %3711 = vmatprep.subr.bf16.mxu1 %v3956_v33 }
 0x3fb   :  { %3712 = vmatpush3.bf16.msra.mxu1 %v3925_v42 }
 0x3fc   :  { %3713 = vmatprep.subr.bf16.mxu1 %v3956_v33 }
 0x3ff   :  { %3714 = vmatpush3.bf16.msra.mxu1 %v3926_v44 }
 0x400   :  { %3715 = vmatprep.subr.bf16.mxu1 %v3956_v33 }
 0x403   :  { %3716 = vmatpush3.bf16.msra.mxu1 %v3927_v22 }
 0x404   :  { %3717 = vmatprep.subr.bf16.mxu1 %v3956_v33 }
 0x407   :  { %3718 = vmatpush3.bf16.msra.mxu1 %v3928_v25 }
 0x408   :  { %3719 = vmatprep.subr.bf16.mxu1 %v3956_v33 }
 0x40b   :  { %3720 = vmatpush3.bf16.msra.mxu1 %v3929_v45 }
 0x40c   :  { %3721 = vmatprep.subr.bf16.mxu1 %v3956_v33 }
 0x40f   :  { %3722 = vmatpush3.bf16.msra.mxu1 %v3930_v56 }
 0x410   :  { %3723 = vmatprep.subr.bf16.mxu1 %v3956_v33 }
 0x413   :  { %3724 = vmatpush3.bf16.msra.mxu1 %v3931_v57 }
 0x4c9   :  { %v2400_v50 = vpop.f32.mrb[36].mxu1 }
 0x4ca   :  { %v2401_v51 = vadd.f32 %v3058_v46, %v2400_v50  ;;  %v3687_v52 = vpop.f32.mrb[37].mxu1 }
 0x4cb   :  { %v2403_v53 = vpop.f32.mrb[38].mxu1 }
 0x4cc   :  { %v2406_v54 = vmax.f32 %v2401_v51, 0.0  ;;  %v3688_v55 = vpop.f32.mrb[39].mxu1 }
 0x4ce   :  { %v2407_v48 = vpack.c.bf16 %v2406_v54, %v2406_v54 }
 0x4d0   :  { %3706 = vmatmul.mubr.bf16.vlgmr.msra.gmra.mrb[64].mxu0 %v2407_v48 }
 0x5a3   :  { %v2513_v59 = vpop.f32.mrb[64].mxu0 }
 0x5a4   :  { %v2514_v60 = vadd.f32 %v3067_v58, %v2513_v59  ;;  %v3707_v61 = vpop.f32.mrb[65].mxu0 }
 0x5a5   :  { %v2516_v62 = vpop.f32.mrb[66].mxu0 }
 0x5a6   :  { %v2519_v63 = vmax.f32 %v2514_v60, 0.0  ;;  %v3708_v29 = vpop.f32.mrb[67].mxu0 }
 0x5a8   :  { %v2520_v34 = vpack.c.bf16 %v2519_v63, %v2519_v63 }
 0x5aa   :  { %3726 = vmatmul.mubr.bf16.vlgmr.msra.gmra.mrb[40].mxu1 %v2520_v34 }
 0x67d   :  { %v2626_v33 = vpop.f32.mrb[40].mxu1 }
 0x67e   :  { %v2627_v1 = vadd.f32 %v3076_v0, %v2626_v33  ;;  %v3727_v2 = vpop.f32.mrb[41].mxu1 }
 0x67f   :  { %v2629_v3 = vpop.f32.mrb[42].mxu1 }
 0x680   :  { %2632 = vst [vmem:[#allocation2] sm:$0x3] %v2627_v1  ;;  %v3728_v4 = vpop.f32.mrb[43].mxu1 }
 0x681   :  { %3943 = shalt.err (!%p3940_p4)
}
 0x682   :  { %s3944_s12 = scalar_lea.hbm %s4940_s13, 32 }
 0x683   :  { %p3945_p5 = scmp.ne.s32.totalorder %s4940_s13, %s3944_s12  ;;  %p3948_p6 = scmp.lt.u32.totalorder %s3944_s12, %s4940_s13 }
 0x685   :  { %p3950_p7 = pnand %p3948_p6, %p3945_p5 }
 0x687   :  { %3953 = shalt.err (!%p3950_p7)
}
 0x688   :  { %2642 = dma.vmem_to_hbm [thread:$0]  %s2640_s18, 32, %s4940_s13, [#allocation3]  }
 0x689   :  { %3954 = dma.done.wait [#allocation3], 32  }
 0x68a   :  { %3955 = vsyncadd [#allocation3], 4294967264 }
 0x68b   :  { %2646 = vsyncpa [#allocation3], 1 }

</bundles_post_ra>
